<compile_context>
chip_gen: v7x
topology: tpu7x:2x2x1
jax: 0.10.0
libtpu: 0.0.40
codegen_flags: <defaults>
</compile_context>

<pallas_src>
import math
import functools

import jax
import jax.numpy as jnp
from jax.experimental import pallas as pl
from jax.experimental.pallas import tpu as pltpu


# ----------------------------------------------------------------------------
# In-kernel helpers
# ----------------------------------------------------------------------------
def _layer_norm(x, gamma, beta, eps=1e-5):
    # PyTorch nn.LayerNorm: biased variance, eps inside the sqrt. (f32 math)
    mu = jnp.mean(x, axis=-1, keepdims=True)
    var = jnp.mean((x - mu) ** 2, axis=-1, keepdims=True)
    return (x - mu) * jax.lax.rsqrt(var + eps) * gamma + beta


# ----------------------------------------------------------------------------
# Fused encoder-stack kernel: all layers in one pallas_call
# ----------------------------------------------------------------------------
def fused_encoder_kernel(x_ref, mask_ref,
                         wq_ref, wk_ref, wv_ref, wcat_ref,
                         w1_ref, w2_ref, vecs_ref, b1_ref,
                         out_ref,
                         x_scr, ctx_scr,
                         *, n_heads, batch_tile, seq_len):
    Bt, N = batch_tile, seq_len
    C = x_ref.shape[1]
    d = C // n_heads
    inv_sqrt_d = 1.0 / math.sqrt(d)
    l = pl.program_id(1)

    # Residual stream loaded into VMEM at the first layer of this batch tile;
    # it stays resident across the layer ("arbitrary") grid axis.
    @pl.when(l == 0)
    def _():
        x_scr[...] = x_ref[...]

    # Packed per-layer vectors: [bq, bk, bv, bcat, ln1_g, ln1_b, b2, ln2_g, ln2_b]
    vecs = vecs_ref[0]                               # (9, C) f32
    bq, bk, bv, bcat = vecs[0:1], vecs[1:2], vecs[2:3], vecs[3:4]
    ln1_g, ln1_b = vecs[4:5], vecs[5:6]
    b2 = vecs[6:7]
    ln2_g, ln2_b = vecs[7:8], vecs[8:9]

    x = x_scr[...]                                   # (Bt*N, C) f32
    x_bf = x.astype(jnp.bfloat16)

    # ---- Multi-head self-attention --------------------------------------
    # Dense Q/K/V projections over all Bt*N rows at once (bf16 MXU, f32 acc).
    q = jnp.dot(x_bf, wq_ref[0], preferred_element_type=jnp.float32) + bq
    k = jnp.dot(x_bf, wk_ref[0], preferred_element_type=jnp.float32) + bk
    v = jnp.dot(x_bf, wv_ref[0], preferred_element_type=jnp.float32) + bv

    # Leading-dim split only (no data movement); keeps batch as an explicit
    # batch dim so attention never leaks across batch elements.
    q3 = q.reshape(Bt, N, C)
    k3 = k.reshape(Bt, N, C)
    v3 = v.reshape(Bt, N, C)
    mask_add = mask_ref[...]                         # (Bt, 1, N): 0 keep / -1e5 masked

    for h in range(n_heads):                         # unrolled only over heads
        c0 = h * d
        # lane-axis slices of f32 values, cast at the dot (no bf16 sublane slicing)
        qh = q3[:, :, c0:c0 + d].astype(jnp.bfloat16)
        kh = k3[:, :, c0:c0 + d].astype(jnp.bfloat16)
        vh = v3[:, :, c0:c0 + d].astype(jnp.bfloat16)
        # scores: batched q_h @ k_h^T  -> (Bt, N, N)
        s = jax.lax.dot_general(qh, kh, (((2,), (2,)), ((0,), (0,))),
                                preferred_element_type=jnp.float32) * inv_sqrt_d
        s = s + mask_add                             # additive mask (hoisted, no where)
        s = s - jnp.max(s, axis=-1, keepdims=True)
        p = jnp.exp(s)
        p = p * pl.reciprocal(jnp.sum(p, axis=-1, keepdims=True), approx=True)
        # context: batched p @ v_h -> (Bt, N, d); written into lane slice of scratch
        ctx_h = jax.lax.dot_general(p.astype(jnp.bfloat16), vh,
                                    (((2,), (1,)), ((0,), (0,))),
                                    preferred_element_type=jnp.float32)
        ctx_scr[:, :, c0:c0 + d] = ctx_h

    # Head concat is already materialized in ctx_scr -> ONE K=C matmul vs w_cat.
    ctx = ctx_scr[...].reshape(Bt * N, C)
    att = jnp.dot(ctx.astype(jnp.bfloat16), wcat_ref[0],
                  preferred_element_type=jnp.float32) + bcat

    # Add & Norm 1 (dropout = identity in eval mode)
    x1 = _layer_norm(att + x, ln1_g, ln1_b)

    # ---- Position-wise feed-forward --------------------------------------
    h1 = jnp.dot(x1.astype(jnp.bfloat16), w1_ref[0],
                 preferred_element_type=jnp.float32) + b1_ref[0]
    h1 = jnp.maximum(h1, 0.0)
    ff = jnp.dot(h1.astype(jnp.bfloat16), w2_ref[0],
                 preferred_element_type=jnp.float32) + b2

    # Add & Norm 2 (dropout = identity); keep residual stream in VMEM
    x2 = _layer_norm(ff + x1, ln2_g, ln2_b)
    x_scr[...] = x2

    @pl.when(l == pl.num_programs(1) - 1)
    def _():
        out_ref[...] = x2.astype(out_ref.dtype)


def _pick_batch_tile(B, N, target_rows=1024, min_tiles=2):
    """Largest divisor of B whose folded row block (<= target_rows) is sublane
    aligned, preferring >= min_tiles batch tiles (v7x megacore)."""
    divs = [bt for bt in range(1, B + 1) if B % bt == 0]
    ok = [bt for bt in divs if (bt * N) % 8 == 0 or bt == B] or [B]
    fit = [bt for bt in ok if bt * N <= max(target_rows, N)] or [min(ok)]
    pref = [bt for bt in fit if B // bt >= min_tiles]
    return max(pref if pref else fit)


def _vmem_bytes_estimate(Bt, N, C, P):
    bf, f4 = 2, 4
    w_layer = (4 * C * C + 2 * C * P) * bf + (9 * C + P) * f4
    x_blk = Bt * N * C * f4
    mask_blk = Bt * N * f4
    out_blk = Bt * N * C * f4
    scratch = 2 * Bt * N * C * f4
    interm = Bt * N * (4 * C + P) * f4 + 2 * Bt * N * N * f4
    # inputs/outputs double-buffered, plus headroom for spills/relayouts
    return 2 * (w_layer + x_blk + mask_blk + out_blk) + scratch + 2 * interm


def fused_encoder(x2d, mask_add, params, n_heads, B, N, target_rows=1024):
    """x2d: (B*N, C) f32; mask_add: (B, 1, N) additive mask. Returns (B*N, C)."""
    C = x2d.shape[1]
    L = params['wq'].shape[0]
    P = params['w1'].shape[2]
    Bt = _pick_batch_tile(B, N, target_rows=target_rows)
    grid = (B // Bt, L)

    def per_layer3(shape):
        return pl.BlockSpec(shape, lambda b, l: (l, 0, 0))

    in_specs = [
        pl.BlockSpec((Bt * N, C), lambda b, l: (b, 0)),      # x  (rows folded)
        pl.BlockSpec((Bt, 1, N), lambda b, l: (b, 0, 0)),    # additive mask
        per_layer3((1, C, C)),                               # wq
        per_layer3((1, C, C)),                               # wk
        per_layer3((1, C, C)),                               # wv
        per_layer3((1, C, C)),                               # wcat
        per_layer3((1, C, P)),                               # w1
        per_layer3((1, P, C)),                               # w2
        per_layer3((1, 9, C)),                               # packed biases / LN vectors
        per_layer3((1, 1, P)),                               # b1
    ]

    est = _vmem_bytes_estimate(Bt, N, C, P)
    vmem_limit = int(min(64 << 20, max(2 * est + (8 << 20), 32 << 20)))

    kernel = functools.partial(fused_encoder_kernel, n_heads=n_heads,
                               batch_tile=Bt, seq_len=N)
    out2d = pl.pallas_call(
        kernel,
        out_shape=jax.ShapeDtypeStruct((B * N, C), jnp.float32),
        grid_spec=pltpu.PrefetchScalarGridSpec(
            num_scalar_prefetch=0,
            grid=grid,
            in_specs=in_specs,
            out_specs=pl.BlockSpec((Bt * N, C), lambda b, l: (b, 0)),
            scratch_shapes=[pltpu.VMEM((Bt * N, C), jnp.float32),   # residual stream
                            pltpu.VMEM((Bt, N, C), jnp.float32)],   # per-head contexts
        ),
        compiler_params=pltpu.CompilerParams(
            dimension_semantics=("parallel", "arbitrary"),
            vmem_limit_bytes=vmem_limit),
    )(x2d, mask_add,
      params['wq'], params['wk'], params['wv'], params['wcat'],
      params['w1'], params['w2'], params['vecs'], params['b1'])
    return out2d


# ----------------------------------------------------------------------------
# Final vocabulary projection: separate pallas_call, lane-dense (padded) V
# ----------------------------------------------------------------------------
def final_linear_kernel(x_ref, w_ref, b_ref, o_ref):
    y = jnp.dot(x_ref[...].astype(jnp.bfloat16), w_ref[...],
                preferred_element_type=jnp.float32) + b_ref[...]
    o_ref[...] = y.astype(o_ref.dtype)


def _row_tile(R, cap=1024):
    if R <= cap:
        return R
    for t in range(cap, 7, -8):
        if R % t == 0:
            return t
    return R


def final_linear(x2d, w_out, b_out, V):
    R, C = x2d.shape
    Vp = max(128, ((V + 127) // 128) * 128)      # lane-dense output tiles
    w_pad = jnp.zeros((C, Vp), jnp.bfloat16).at[:, :V].set(w_out.astype(jnp.bfloat16))
    b_pad = jnp.zeros((1, Vp), jnp.float32).at[:, :V].set(b_out.astype(jnp.float32))

    tm = _row_tile(R)
    tn = Vp if Vp <= 512 else (512 if Vp % 512 == 0 else Vp)
    grid = (R // tm, Vp // tn)

    out = pl.pallas_call(
        final_linear_kernel,
        out_shape=jax.ShapeDtypeStruct((R, Vp), jnp.float32),
        grid_spec=pltpu.PrefetchScalarGridSpec(
            num_scalar_prefetch=0,
            grid=grid,
            in_specs=[pl.BlockSpec((tm, C), lambda i, j: (i, 0)),
                      pl.BlockSpec((C, tn), lambda i, j: (0, j)),
                      pl.BlockSpec((1, tn), lambda i, j: (0, j))],
            out_specs=pl.BlockSpec((tm, tn), lambda i, j: (i, j))),
        compiler_params=pltpu.CompilerParams(
            dimension_semantics=("parallel", "parallel")),
    )(x2d, w_pad, b_pad)
    return out[:, :V]


# ----------------------------------------------------------------------------
# Parameter construction (deterministic, synthetic; Linear weights stored (in, out))
# ----------------------------------------------------------------------------
def init_params(key, input_dim, hid_dim, n_layers, pf_dim, max_length=200):
    C, P, V = hid_dim, pf_dim, input_dim

    def nrm(k, shape, scale=0.05, dtype=jnp.bfloat16):
        return (scale * jax.random.normal(k, shape)).astype(dtype)

    keys = jax.random.split(key, 3 + 8 * n_layers)
    tok = 0.05 * jax.random.normal(keys[0], (input_dim, hid_dim))
    params = {
        # sqrt(hid_dim) embedding scale folded into the token-embedding table
        'tok_emb_scaled': (tok * math.sqrt(hid_dim)).astype(jnp.float32),
        'pos_emb': (0.05 * jax.random.normal(keys[1], (max_length, hid_dim))
                    ).astype(jnp.float32),
        'w_out': nrm(keys[2], (C, V)),                       # bf16 for the MXU
        'b_out': jnp.zeros((1, V), jnp.float32),
    }

    wq, wk, wv, wcat, w1, w2, vecs, b1 = [], [], [], [], [], [], [], []
    for layer in range(n_layers):
        k = keys[3 + 8 * layer: 3 + 8 * (layer + 1)]
        wq.append(nrm(k[0], (C, C)))
        wk.append(nrm(k[1], (C, C)))
        wv.append(nrm(k[2], (C, C)))
        wcat.append(nrm(k[3], (C, C)))
        w1.append(nrm(k[4], (C, P)))
        w2.append(nrm(k[5], (P, C)))
        # packed vectors: [bq, bk, bv, bcat, ln1_g, ln1_b, b2, ln2_g, ln2_b]
        v9 = 0.02 * jax.random.normal(k[6], (9, C))
        v9 = v9.at[4].set(1.0).at[7].set(1.0)                # LayerNorm gammas = 1
        v9 = v9.at[5].set(0.0).at[8].set(0.0)                # LayerNorm betas  = 0
        vecs.append(v9.astype(jnp.float32))
        b1.append((0.02 * jax.random.normal(k[7], (1, P))).astype(jnp.float32))

    params.update({
        'wq': jnp.stack(wq), 'wk': jnp.stack(wk), 'wv': jnp.stack(wv),
        'wcat': jnp.stack(wcat), 'w1': jnp.stack(w1), 'w2': jnp.stack(w2),
        'vecs': jnp.stack(vecs), 'b1': jnp.stack(b1),
    })
    return params


# ----------------------------------------------------------------------------
# Full Encoder forward
# ----------------------------------------------------------------------------
def encoder_forward(src, src_mask, params, n_heads):
    """src: (B, N) int32 token ids; src_mask: (B, 1, 1, N) (1=keep, 0=mask)."""
    B, N = src.shape
    C = params['tok_emb_scaled'].shape[1]
    assert N <= params['pos_emb'].shape[0], "sequence length exceeds max_length"

    # Embedding gather + positional encoding (glue stays in plain JAX).
    tok = params['tok_emb_scaled'][src]                 # scale already folded in
    pos = params['pos_emb'][:N][None, :, :]
    x = (tok + pos).astype(jnp.float32)                 # dropout = identity (eval)

    # Additive key mask: 0 where kept, -100000 where masked (computed once).
    mask_add = (src_mask.reshape(B, 1, N).astype(jnp.float32) - 1.0) * 100000.0

    x2d = x.reshape(B * N, C)                            # free row-fold for the MXU
    res2d = fused_encoder(x2d, mask_add, params, n_heads, B, N)
    V = params['w_out'].shape[1]
    out2d = final_linear(res2d, params['w_out'], params['b_out'], V)
    return out2d.reshape(B, N, V)


# ----------------------------------------------------------------------------
if __name__ == "__main__":
    input_dim = 16   # vocab size
    hid_dim = 32
    n_layers = 2
    n_heads = 4
    pf_dim = 64
    B, N = 2, 8

    key = jax.random.PRNGKey(0)
    k_param, k_src = jax.random.split(key)
    params = init_params(k_param, input_dim, hid_dim, n_layers, pf_dim)

    src = jax.random.randint(k_src, (B, N), 0, input_dim, dtype=jnp.int32)
    src_mask = jnp.ones((B, 1, 1, N), jnp.float32)
    src_mask = src_mask.at[1, 0, 0, 6:].set(0.0)   # mask the tail of batch 1

    out = encoder_forward(src, src_mask, params, n_heads)
    jax.block_until_ready(out)
    assert out.shape == (B, N, input_dim)
    print("KERNEL_OK")
</pallas_src>

<mosaic_0001>
module attributes {stable_mosaic.version = 11 : i64} {
  func.func @fused_encoder_kernel(%arg0: i32, %arg1: i32, %arg2: memref<8x32xf32, #tpu.memory_space<vmem>>, %arg3: memref<1x1x8xf32, #tpu.memory_space<vmem>>, %arg4: memref<1x32x32xbf16, #tpu.memory_space<vmem>>, %arg5: memref<1x32x32xbf16, #tpu.memory_space<vmem>>, %arg6: memref<1x32x32xbf16, #tpu.memory_space<vmem>>, %arg7: memref<1x32x32xbf16, #tpu.memory_space<vmem>>, %arg8: memref<1x32x64xbf16, #tpu.memory_space<vmem>>, %arg9: memref<1x64x32xbf16, #tpu.memory_space<vmem>>, %arg10: memref<1x9x32xf32, #tpu.memory_space<vmem>>, %arg11: memref<1x1x64xf32, #tpu.memory_space<vmem>>, %arg12: memref<8x32xf32, #tpu.memory_space<vmem>>, %arg13: memref<8x32xf32, #tpu.memory_space<vmem>>, %arg14: memref<1x8x32xf32, #tpu.memory_space<vmem>>) attributes {dimension_semantics = [#tpu.dimension_semantics<parallel>, #tpu.dimension_semantics<arbitrary>], iteration_bounds = array<i64: 2, 2>, scalar_prefetch = 0 : i64, scratch_operands = 2 : i64, tpu.core_type = #tpu.core_type<tc>, window_params = [{transform_indices = @transform_0, window_bounds = array<i64: 8, 32>}, {transform_indices = @transform_1, window_bounds = array<i64: 1, 1, 8>}, {transform_indices = @transform_2, window_bounds = array<i64: 1, 32, 32>}, {transform_indices = @transform_3, window_bounds = array<i64: 1, 32, 32>}, {transform_indices = @transform_4, window_bounds = array<i64: 1, 32, 32>}, {transform_indices = @transform_5, window_bounds = array<i64: 1, 32, 32>}, {transform_indices = @transform_6, window_bounds = array<i64: 1, 32, 64>}, {transform_indices = @transform_7, window_bounds = array<i64: 1, 64, 32>}, {transform_indices = @transform_8, window_bounds = array<i64: 1, 9, 32>}, {transform_indices = @transform_9, window_bounds = array<i64: 1, 1, 64>}, {transform_indices = @transform_10, window_bounds = array<i64: 8, 32>}]} {
    %c0_i32 = arith.constant 0 : i32
    %0 = arith.cmpi eq, %arg1, %c0_i32 : i32
    %1 = arith.extui %0 : i1 to i32
    %c0_i32_0 = arith.constant 0 : i32
    %2 = arith.cmpi ne, %1, %c0_i32_0 : i32
    scf.if %2 {
      %c0_80 = arith.constant 0 : index
      %c0_81 = arith.constant 0 : index
      %205 = vector.load %arg2[%c0_80, %c0_81] : memref<8x32xf32, #tpu.memory_space<vmem>>, vector<8x32xf32>
      %c0_82 = arith.constant 0 : index
      %c0_83 = arith.constant 0 : index
      %206 = vector.load %arg13[%c0_82, %c0_83] : memref<8x32xf32, #tpu.memory_space<vmem>>, vector<8x32xf32>
      tpu.vector_store %arg13[%c0_82, %c0_83], %205 {strides = array<i32>} : memref<8x32xf32, #tpu.memory_space<vmem>>, vector<8x32xf32>,
    } else {
    }
    %c0 = arith.constant 0 : index
    %c0_1 = arith.constant 0 : index
    %c0_2 = arith.constant 0 : index
    %3 = vector.load %arg10[%c0, %c0_1, %c0_2] : memref<1x9x32xf32, #tpu.memory_space<vmem>>, vector<1x9x32xf32>
    %4 = vector.shape_cast %3 : vector<1x9x32xf32> to vector<9x32xf32>
    %5 = vector.extract_strided_slice %4 {offsets = [0, 0], sizes = [1, 32], strides = [1, 1]} : vector<9x32xf32> to vector<1x32xf32>
    %6 = vector.extract_strided_slice %4 {offsets = [1, 0], sizes = [1, 32], strides = [1, 1]} : vector<9x32xf32> to vector<1x32xf32>
    %7 = vector.extract_strided_slice %4 {offsets = [2, 0], sizes = [1, 32], strides = [1, 1]} : vector<9x32xf32> to vector<1x32xf32>
    %8 = vector.extract_strided_slice %4 {offsets = [3, 0], sizes = [1, 32], strides = [1, 1]} : vector<9x32xf32> to vector<1x32xf32>
    %9 = vector.extract_strided_slice %4 {offsets = [4, 0], sizes = [1, 32], strides = [1, 1]} : vector<9x32xf32> to vector<1x32xf32>
    %10 = vector.extract_strided_slice %4 {offsets = [5, 0], sizes = [1, 32], strides = [1, 1]} : vector<9x32xf32> to vector<1x32xf32>
    %11 = vector.extract_strided_slice %4 {offsets = [6, 0], sizes = [1, 32], strides = [1, 1]} : vector<9x32xf32> to vector<1x32xf32>
    %12 = vector.extract_strided_slice %4 {offsets = [7, 0], sizes = [1, 32], strides = [1, 1]} : vector<9x32xf32> to vector<1x32xf32>
    %13 = vector.extract_strided_slice %4 {offsets = [8, 0], sizes = [1, 32], strides = [1, 1]} : vector<9x32xf32> to vector<1x32xf32>
    %c0_3 = arith.constant 0 : index
    %c0_4 = arith.constant 0 : index
    %14 = vector.load %arg13[%c0_3, %c0_4] : memref<8x32xf32, #tpu.memory_space<vmem>>, vector<8x32xf32>
    %15 = arith.truncf %14 : vector<8x32xf32> to vector<8x32xbf16>
    %c0_5 = arith.constant 0 : index
    %c0_6 = arith.constant 0 : index
    %c0_7 = arith.constant 0 : index
    %16 = vector.load %arg4[%c0_5, %c0_6, %c0_7] : memref<1x32x32xbf16, #tpu.memory_space<vmem>>, vector<1x32x32xbf16>
    %17 = vector.shape_cast %16 : vector<1x32x32xbf16> to vector<32x32xbf16>
    %cst = arith.constant dense<0.000000e+00> : vector<8x32xf32>
    %18 = tpu.matmul %15, %17, %cst {dimension_numbers = #tpu.dot_dimension_numbers<[1], [0], [0], [1], [0, 0, 1, 1], [], []>} : vector<8x32xbf16>, vector<32x32xbf16>, vector<8x32xf32> -> vector<8x32xf32>
    %19 = vector.broadcast %5 : vector<1x32xf32> to vector<8x32xf32>
    %20 = arith.addf %18, %19 : vector<8x32xf32>
    %c0_8 = arith.constant 0 : index
    %c0_9 = arith.constant 0 : index
    %c0_10 = arith.constant 0 : index
    %21 = vector.load %arg5[%c0_8, %c0_9, %c0_10] : memref<1x32x32xbf16, #tpu.memory_space<vmem>>, vector<1x32x32xbf16>
    %22 = vector.shape_cast %21 : vector<1x32x32xbf16> to vector<32x32xbf16>
    %cst_11 = arith.constant dense<0.000000e+00> : vector<8x32xf32>
    %23 = tpu.matmul %15, %22, %cst_11 {dimension_numbers = #tpu.dot_dimension_numbers<[1], [0], [0], [1], [0, 0, 1, 1], [], []>} : vector<8x32xbf16>, vector<32x32xbf16>, vector<8x32xf32> -> vector<8x32xf32>
    %24 = vector.broadcast %6 : vector<1x32xf32> to vector<8x32xf32>
    %25 = arith.addf %23, %24 : vector<8x32xf32>
    %c0_12 = arith.constant 0 : index
    %c0_13 = arith.constant 0 : index
    %c0_14 = arith.constant 0 : index
    %26 = vector.load %arg6[%c0_12, %c0_13, %c0_14] : memref<1x32x32xbf16, #tpu.memory_space<vmem>>, vector<1x32x32xbf16>
    %27 = vector.shape_cast %26 : vector<1x32x32xbf16> to vector<32x32xbf16>
    %cst_15 = arith.constant dense<0.000000e+00> : vector<8x32xf32>
    %28 = tpu.matmul %15, %27, %cst_15 {dimension_numbers = #tpu.dot_dimension_numbers<[1], [0], [0], [1], [0, 0, 1, 1], [], []>} : vector<8x32xbf16>, vector<32x32xbf16>, vector<8x32xf32> -> vector<8x32xf32>
    %29 = vector.broadcast %7 : vector<1x32xf32> to vector<8x32xf32>
    %30 = arith.addf %28, %29 : vector<8x32xf32>
    %31 = vector.shape_cast %20 : vector<8x32xf32> to vector<1x8x32xf32>
    %32 = vector.shape_cast %25 : vector<8x32xf32> to vector<1x8x32xf32>
    %33 = vector.shape_cast %30 : vector<8x32xf32> to vector<1x8x32xf32>
    %c0_16 = arith.constant 0 : index
    %c0_17 = arith.constant 0 : index
    %c0_18 = arith.constant 0 : index
    %34 = vector.load %arg3[%c0_16, %c0_17, %c0_18] : memref<1x1x8xf32, #tpu.memory_space<vmem>>, vector<1x1x8xf32>
    %35 = vector.extract_strided_slice %31 {offsets = [0, 0, 0], sizes = [1, 8, 8], strides = [1, 1, 1]} : vector<1x8x32xf32> to vector<1x8x8xf32>
    %36 = arith.truncf %35 : vector<1x8x8xf32> to vector<1x8x8xbf16>
    %37 = vector.extract_strided_slice %32 {offsets = [0, 0, 0], sizes = [1, 8, 8], strides = [1, 1, 1]} : vector<1x8x32xf32> to vector<1x8x8xf32>
    %38 = arith.truncf %37 : vector<1x8x8xf32> to vector<1x8x8xbf16>
    %39 = vector.extract_strided_slice %33 {offsets = [0, 0, 0], sizes = [1, 8, 8], strides = [1, 1, 1]} : vector<1x8x32xf32> to vector<1x8x8xf32>
    %40 = arith.truncf %39 : vector<1x8x8xf32> to vector<1x8x8xbf16>
    %cst_19 = arith.constant dense<0.000000e+00> : vector<1x8x8xf32>
    %41 = tpu.matmul %36, %38, %cst_19 {dimension_numbers = #tpu.dot_dimension_numbers<[2], [2], [1], [1], [0, 0, 0, 1, 1, 1], [0], [0]>} : vector<1x8x8xbf16>, vector<1x8x8xbf16>, vector<1x8x8xf32> -> vector<1x8x8xf32>
    %cst_20 = arith.constant 0.353553385 : f32
    %42 = vector.broadcast %cst_20 : f32 to vector<1x8x8xf32>
    %43 = arith.mulf %41, %42 : vector<1x8x8xf32>
    %44 = vector.broadcast %34 : vector<1x1x8xf32> to vector<1x8x8xf32>
    %45 = arith.addf %43, %44 : vector<1x8x8xf32>
    %cst_21 = arith.constant dense<0xFF800000> : vector<1x8xf32>
    %46 = vector.multi_reduction <maximumf>, %45, %cst_21 [2] : vector<1x8x8xf32> to vector<1x8xf32>
    %47 = vector.shape_cast %46 : vector<1x8xf32> to vector<1x8x1xf32>
    %48 = vector.broadcast %47 : vector<1x8x1xf32> to vector<1x8x8xf32>
    %49 = arith.subf %45, %48 : vector<1x8x8xf32>
    %50 = math.exp %49 : vector<1x8x8xf32>
    %cst_22 = arith.constant dense<0.000000e+00> : vector<1x8xf32>
    %51 = vector.multi_reduction <add>, %50, %cst_22 [2] : vector<1x8x8xf32> to vector<1x8xf32>
    %52 = vector.shape_cast %51 : vector<1x8xf32> to vector<1x8x1xf32>
    %53 = tpu.reciprocal %52 {approx = true} : vector<1x8x1xf32> -> vector<1x8x1xf32>
    %54 = vector.broadcast %53 : vector<1x8x1xf32> to vector<1x8x8xf32>
    %55 = arith.mulf %50, %54 : vector<1x8x8xf32>
    %56 = arith.truncf %55 : vector<1x8x8xf32> to vector<1x8x8xbf16>
    %cst_23 = arith.constant dense<0.000000e+00> : vector<1x8x8xf32>
    %57 = tpu.matmul %56, %40, %cst_23 {dimension_numbers = #tpu.dot_dimension_numbers<[2], [1], [1], [2], [0, 0, 0, 1, 1, 2], [0], [0]>} : vector<1x8x8xbf16>, vector<1x8x8xbf16>, vector<1x8x8xf32> -> vector<1x8x8xf32>
    %c0_24 = arith.constant 0 : index
    %c0_25 = arith.constant 0 : index
    %c0_26 = arith.constant 0 : index
    %58 = vector.load %arg14[%c0_24, %c0_25, %c0_26] : memref<1x8x32xf32, #tpu.memory_space<vmem>>, vector<1x8x8xf32>
    tpu.vector_store %arg14[%c0_24, %c0_25, %c0_26], %57 {strides = array<i32>} : memref<1x8x32xf32, #tpu.memory_space<vmem>>, vector<1x8x8xf32>,
    %59 = vector.extract_strided_slice %31 {offsets = [0, 0, 8], sizes = [1, 8, 8], strides = [1, 1, 1]} : vector<1x8x32xf32> to vector<1x8x8xf32>
    %60 = arith.truncf %59 : vector<1x8x8xf32> to vector<1x8x8xbf16>
    %61 = vector.extract_strided_slice %32 {offsets = [0, 0, 8], sizes = [1, 8, 8], strides = [1, 1, 1]} : vector<1x8x32xf32> to vector<1x8x8xf32>
    %62 = arith.truncf %61 : vector<1x8x8xf32> to vector<1x8x8xbf16>
    %63 = vector.extract_strided_slice %33 {offsets = [0, 0, 8], sizes = [1, 8, 8], strides = [1, 1, 1]} : vector<1x8x32xf32> to vector<1x8x8xf32>
    %64 = arith.truncf %63 : vector<1x8x8xf32> to vector<1x8x8xbf16>
    %cst_27 = arith.constant dense<0.000000e+00> : vector<1x8x8xf32>
    %65 = tpu.matmul %60, %62, %cst_27 {dimension_numbers = #tpu.dot_dimension_numbers<[2], [2], [1], [1], [0, 0, 0, 1, 1, 1], [0], [0]>} : vector<1x8x8xbf16>, vector<1x8x8xbf16>, vector<1x8x8xf32> -> vector<1x8x8xf32>
    %cst_28 = arith.constant 0.353553385 : f32
    %66 = vector.broadcast %cst_28 : f32 to vector<1x8x8xf32>
    %67 = arith.mulf %65, %66 : vector<1x8x8xf32>
    %68 = vector.broadcast %34 : vector<1x1x8xf32> to vector<1x8x8xf32>
    %69 = arith.addf %67, %68 : vector<1x8x8xf32>
    %cst_29 = arith.constant dense<0xFF800000> : vector<1x8xf32>
    %70 = vector.multi_reduction <maximumf>, %69, %cst_29 [2] : vector<1x8x8xf32> to vector<1x8xf32>
    %71 = vector.shape_cast %70 : vector<1x8xf32> to vector<1x8x1xf32>
    %72 = vector.broadcast %71 : vector<1x8x1xf32> to vector<1x8x8xf32>
    %73 = arith.subf %69, %72 : vector<1x8x8xf32>
    %74 = math.exp %73 : vector<1x8x8xf32>
    %cst_30 = arith.constant dense<0.000000e+00> : vector<1x8xf32>
    %75 = vector.multi_reduction <add>, %74, %cst_30 [2] : vector<1x8x8xf32> to vector<1x8xf32>
    %76 = vector.shape_cast %75 : vector<1x8xf32> to vector<1x8x1xf32>
    %77 = tpu.reciprocal %76 {approx = true} : vector<1x8x1xf32> -> vector<1x8x1xf32>
    %78 = vector.broadcast %77 : vector<1x8x1xf32> to vector<1x8x8xf32>
    %79 = arith.mulf %74, %78 : vector<1x8x8xf32>
    %80 = arith.truncf %79 : vector<1x8x8xf32> to vector<1x8x8xbf16>
    %cst_31 = arith.constant dense<0.000000e+00> : vector<1x8x8xf32>
    %81 = tpu.matmul %80, %64, %cst_31 {dimension_numbers = #tpu.dot_dimension_numbers<[2], [1], [1], [2], [0, 0, 0, 1, 1, 2], [0], [0]>} : vector<1x8x8xbf16>, vector<1x8x8xbf16>, vector<1x8x8xf32> -> vector<1x8x8xf32>
    %c0_32 = arith.constant 0 : index
    %c0_33 = arith.constant 0 : index
    %c8 = arith.constant 8 : index
    %82 = vector.load %arg14[%c0_32, %c0_33, %c8] : memref<1x8x32xf32, #tpu.memory_space<vmem>>, vector<1x8x8xf32>
    tpu.vector_store %arg14[%c0_32, %c0_33, %c8], %81 {strides = array<i32>} : memref<1x8x32xf32, #tpu.memory_space<vmem>>, vector<1x8x8xf32>,
    %83 = vector.extract_strided_slice %31 {offsets = [0, 0, 16], sizes = [1, 8, 8], strides = [1, 1, 1]} : vector<1x8x32xf32> to vector<1x8x8xf32>
    %84 = arith.truncf %83 : vector<1x8x8xf32> to vector<1x8x8xbf16>
    %85 = vector.extract_strided_slice %32 {offsets = [0, 0, 16], sizes = [1, 8, 8], strides = [1, 1, 1]} : vector<1x8x32xf32> to vector<1x8x8xf32>
    %86 = arith.truncf %85 : vector<1x8x8xf32> to vector<1x8x8xbf16>
    %87 = vector.extract_strided_slice %33 {offsets = [0, 0, 16], sizes = [1, 8, 8], strides = [1, 1, 1]} : vector<1x8x32xf32> to vector<1x8x8xf32>
    %88 = arith.truncf %87 : vector<1x8x8xf32> to vector<1x8x8xbf16>
    %cst_34 = arith.constant dense<0.000000e+00> : vector<1x8x8xf32>
    %89 = tpu.matmul %84, %86, %cst_34 {dimension_numbers = #tpu.dot_dimension_numbers<[2], [2], [1], [1], [0, 0, 0, 1, 1, 1], [0], [0]>} : vector<1x8x8xbf16>, vector<1x8x8xbf16>, vector<1x8x8xf32> -> vector<1x8x8xf32>
    %cst_35 = arith.constant 0.353553385 : f32
    %90 = vector.broadcast %cst_35 : f32 to vector<1x8x8xf32>
    %91 = arith.mulf %89, %90 : vector<1x8x8xf32>
    %92 = vector.broadcast %34 : vector<1x1x8xf32> to vector<1x8x8xf32>
    %93 = arith.addf %91, %92 : vector<1x8x8xf32>
    %cst_36 = arith.constant dense<0xFF800000> : vector<1x8xf32>
    %94 = vector.multi_reduction <maximumf>, %93, %cst_36 [2] : vector<1x8x8xf32> to vector<1x8xf32>
    %95 = vector.shape_cast %94 : vector<1x8xf32> to vector<1x8x1xf32>
    %96 = vector.broadcast %95 : vector<1x8x1xf32> to vector<1x8x8xf32>
    %97 = arith.subf %93, %96 : vector<1x8x8xf32>
    %98 = math.exp %97 : vector<1x8x8xf32>
    %cst_37 = arith.constant dense<0.000000e+00> : vector<1x8xf32>
    %99 = vector.multi_reduction <add>, %98, %cst_37 [2] : vector<1x8x8xf32> to vector<1x8xf32>
    %100 = vector.shape_cast %99 : vector<1x8xf32> to vector<1x8x1xf32>
    %101 = tpu.reciprocal %100 {approx = true} : vector<1x8x1xf32> -> vector<1x8x1xf32>
    %102 = vector.broadcast %101 : vector<1x8x1xf32> to vector<1x8x8xf32>
    %103 = arith.mulf %98, %102 : vector<1x8x8xf32>
    %104 = arith.truncf %103 : vector<1x8x8xf32> to vector<1x8x8xbf16>
    %cst_38 = arith.constant dense<0.000000e+00> : vector<1x8x8xf32>
    %105 = tpu.matmul %104, %88, %cst_38 {dimension_numbers = #tpu.dot_dimension_numbers<[2], [1], [1], [2], [0, 0, 0, 1, 1, 2], [0], [0]>} : vector<1x8x8xbf16>, vector<1x8x8xbf16>, vector<1x8x8xf32> -> vector<1x8x8xf32>
    %c0_39 = arith.constant 0 : index
    %c0_40 = arith.constant 0 : index
    %c16 = arith.constant 16 : index
    %106 = vector.load %arg14[%c0_39, %c0_40, %c16] : memref<1x8x32xf32, #tpu.memory_space<vmem>>, vector<1x8x8xf32>
    tpu.vector_store %arg14[%c0_39, %c0_40, %c16], %105 {strides = array<i32>} : memref<1x8x32xf32, #tpu.memory_space<vmem>>, vector<1x8x8xf32>,
    %107 = vector.extract_strided_slice %31 {offsets = [0, 0, 24], sizes = [1, 8, 8], strides = [1, 1, 1]} : vector<1x8x32xf32> to vector<1x8x8xf32>
    %108 = arith.truncf %107 : vector<1x8x8xf32> to vector<1x8x8xbf16>
    %109 = vector.extract_strided_slice %32 {offsets = [0, 0, 24], sizes = [1, 8, 8], strides = [1, 1, 1]} : vector<1x8x32xf32> to vector<1x8x8xf32>
    %110 = arith.truncf %109 : vector<1x8x8xf32> to vector<1x8x8xbf16>
    %111 = vector.extract_strided_slice %33 {offsets = [0, 0, 24], sizes = [1, 8, 8], strides = [1, 1, 1]} : vector<1x8x32xf32> to vector<1x8x8xf32>
    %112 = arith.truncf %111 : vector<1x8x8xf32> to vector<1x8x8xbf16>
    %cst_41 = arith.constant dense<0.000000e+00> : vector<1x8x8xf32>
    %113 = tpu.matmul %108, %110, %cst_41 {dimension_numbers = #tpu.dot_dimension_numbers<[2], [2], [1], [1], [0, 0, 0, 1, 1, 1], [0], [0]>} : vector<1x8x8xbf16>, vector<1x8x8xbf16>, vector<1x8x8xf32> -> vector<1x8x8xf32>
    %cst_42 = arith.constant 0.353553385 : f32
    %114 = vector.broadcast %cst_42 : f32 to vector<1x8x8xf32>
    %115 = arith.mulf %113, %114 : vector<1x8x8xf32>
    %116 = vector.broadcast %34 : vector<1x1x8xf32> to vector<1x8x8xf32>
    %117 = arith.addf %115, %116 : vector<1x8x8xf32>
    %cst_43 = arith.constant dense<0xFF800000> : vector<1x8xf32>
    %118 = vector.multi_reduction <maximumf>, %117, %cst_43 [2] : vector<1x8x8xf32> to vector<1x8xf32>
    %119 = vector.shape_cast %118 : vector<1x8xf32> to vector<1x8x1xf32>
    %120 = vector.broadcast %119 : vector<1x8x1xf32> to vector<1x8x8xf32>
    %121 = arith.subf %117, %120 : vector<1x8x8xf32>
    %122 = math.exp %121 : vector<1x8x8xf32>
    %cst_44 = arith.constant dense<0.000000e+00> : vector<1x8xf32>
    %123 = vector.multi_reduction <add>, %122, %cst_44 [2] : vector<1x8x8xf32> to vector<1x8xf32>
    %124 = vector.shape_cast %123 : vector<1x8xf32> to vector<1x8x1xf32>
    %125 = tpu.reciprocal %124 {approx = true} : vector<1x8x1xf32> -> vector<1x8x1xf32>
    %126 = vector.broadcast %125 : vector<1x8x1xf32> to vector<1x8x8xf32>
    %127 = arith.mulf %122, %126 : vector<1x8x8xf32>
    %128 = arith.truncf %127 : vector<1x8x8xf32> to vector<1x8x8xbf16>
    %cst_45 = arith.constant dense<0.000000e+00> : vector<1x8x8xf32>
    %129 = tpu.matmul %128, %112, %cst_45 {dimension_numbers = #tpu.dot_dimension_numbers<[2], [1], [1], [2], [0, 0, 0, 1, 1, 2], [0], [0]>} : vector<1x8x8xbf16>, vector<1x8x8xbf16>, vector<1x8x8xf32> -> vector<1x8x8xf32>
    %c0_46 = arith.constant 0 : index
    %c0_47 = arith.constant 0 : index
    %c24 = arith.constant 24 : index
    %130 = vector.load %arg14[%c0_46, %c0_47, %c24] : memref<1x8x32xf32, #tpu.memory_space<vmem>>, vector<1x8x8xf32>
    tpu.vector_store %arg14[%c0_46, %c0_47, %c24], %129 {strides = array<i32>} : memref<1x8x32xf32, #tpu.memory_space<vmem>>, vector<1x8x8xf32>,
    %c0_48 = arith.constant 0 : index
    %c0_49 = arith.constant 0 : index
    %c0_50 = arith.constant 0 : index
    %131 = vector.load %arg14[%c0_48, %c0_49, %c0_50] : memref<1x8x32xf32, #tpu.memory_space<vmem>>, vector<1x8x32xf32>
    %132 = vector.shape_cast %131 : vector<1x8x32xf32> to vector<8x32xf32>
    %133 = arith.truncf %132 : vector<8x32xf32> to vector<8x32xbf16>
    %c0_51 = arith.constant 0 : index
    %c0_52 = arith.constant 0 : index
    %c0_53 = arith.constant 0 : index
    %134 = vector.load %arg7[%c0_51, %c0_52, %c0_53] : memref<1x32x32xbf16, #tpu.memory_space<vmem>>, vector<1x32x32xbf16>
    %135 = vector.shape_cast %134 : vector<1x32x32xbf16> to vector<32x32xbf16>
    %cst_54 = arith.constant dense<0.000000e+00> : vector<8x32xf32>
    %136 = tpu.matmul %133, %135, %cst_54 {dimension_numbers = #tpu.dot_dimension_numbers<[1], [0], [0], [1], [0, 0, 1, 1], [], []>} : vector<8x32xbf16>, vector<32x32xbf16>, vector<8x32xf32> -> vector<8x32xf32>
    %137 = vector.broadcast %8 : vector<1x32xf32> to vector<8x32xf32>
    %138 = arith.addf %136, %137 : vector<8x32xf32>
    %139 = arith.addf %138, %14 : vector<8x32xf32>
    %cst_55 = arith.constant dense<0.000000e+00> : vector<8xf32>
    %140 = vector.multi_reduction <add>, %139, %cst_55 [1] : vector<8x32xf32> to vector<8xf32>
    %141 = vector.shape_cast %140 : vector<8xf32> to vector<8x1xf32>
    %cst_56 = arith.constant 3.200000e+01 : f32
    %142 = vector.broadcast %cst_56 : f32 to vector<8x1xf32>
    %143 = arith.divf %141, %142 : vector<8x1xf32>
    %144 = vector.broadcast %143 : vector<8x1xf32> to vector<8x32xf32>
    %145 = arith.subf %139, %144 : vector<8x32xf32>
    %146 = arith.mulf %145, %145 : vector<8x32xf32>
    %cst_57 = arith.constant dense<0.000000e+00> : vector<8xf32>
    %147 = vector.multi_reduction <add>, %146, %cst_57 [1] : vector<8x32xf32> to vector<8xf32>
    %148 = vector.shape_cast %147 : vector<8xf32> to vector<8x1xf32>
    %cst_58 = arith.constant 3.200000e+01 : f32
    %149 = vector.broadcast %cst_58 : f32 to vector<8x1xf32>
    %150 = arith.divf %148, %149 : vector<8x1xf32>
    %151 = vector.broadcast %143 : vector<8x1xf32> to vector<8x32xf32>
    %152 = arith.subf %139, %151 : vector<8x32xf32>
    %cst_59 = arith.constant 9.99999974E-6 : f32
    %153 = vector.broadcast %cst_59 : f32 to vector<8x1xf32>
    %154 = arith.addf %150, %153 : vector<8x1xf32>
    %155 = math.rsqrt %154 : vector<8x1xf32>
    %156 = vector.broadcast %155 : vector<8x1xf32> to vector<8x32xf32>
    %157 = arith.mulf %152, %156 : vector<8x32xf32>
    %158 = vector.broadcast %9 : vector<1x32xf32> to vector<8x32xf32>
    %159 = arith.mulf %157, %158 : vector<8x32xf32>
    %160 = vector.broadcast %10 : vector<1x32xf32> to vector<8x32xf32>
    %161 = arith.addf %159, %160 : vector<8x32xf32>
    %162 = arith.truncf %161 : vector<8x32xf32> to vector<8x32xbf16>
    %c0_60 = arith.constant 0 : index
    %c0_61 = arith.constant 0 : index
    %c0_62 = arith.constant 0 : index
    %163 = vector.load %arg8[%c0_60, %c0_61, %c0_62] : memref<1x32x64xbf16, #tpu.memory_space<vmem>>, vector<1x32x64xbf16>
    %164 = vector.shape_cast %163 : vector<1x32x64xbf16> to vector<32x64xbf16>
    %cst_63 = arith.constant dense<0.000000e+00> : vector<8x64xf32>
    %165 = tpu.matmul %162, %164, %cst_63 {dimension_numbers = #tpu.dot_dimension_numbers<[1], [0], [0], [1], [0, 0, 1, 1], [], []>} : vector<8x32xbf16>, vector<32x64xbf16>, vector<8x64xf32> -> vector<8x64xf32>
    %c0_64 = arith.constant 0 : index
    %c0_65 = arith.constant 0 : index
    %c0_66 = arith.constant 0 : index
    %166 = vector.load %arg11[%c0_64, %c0_65, %c0_66] : memref<1x1x64xf32, #tpu.memory_space<vmem>>, vector<1x1x64xf32>
    %167 = vector.shape_cast %166 : vector<1x1x64xf32> to vector<1x64xf32>
    %168 = vector.broadcast %167 : vector<1x64xf32> to vector<8x64xf32>
    %169 = arith.addf %165, %168 : vector<8x64xf32>
    %cst_67 = arith.constant 0.000000e+00 : f32
    %170 = vector.broadcast %cst_67 : f32 to vector<8x64xf32>
    %171 = arith.maximumf %169, %170 : vector<8x64xf32>
    %172 = arith.truncf %171 : vector<8x64xf32> to vector<8x64xbf16>
    %c0_68 = arith.constant 0 : index
    %c0_69 = arith.constant 0 : index
    %c0_70 = arith.constant 0 : index
    %173 = vector.load %arg9[%c0_68, %c0_69, %c0_70] : memref<1x64x32xbf16, #tpu.memory_space<vmem>>, vector<1x64x32xbf16>
    %174 = vector.shape_cast %173 : vector<1x64x32xbf16> to vector<64x32xbf16>
    %cst_71 = arith.constant dense<0.000000e+00> : vector<8x32xf32>
    %175 = tpu.matmul %172, %174, %cst_71 {dimension_numbers = #tpu.dot_dimension_numbers<[1], [0], [0], [1], [0, 0, 1, 1], [], []>} : vector<8x64xbf16>, vector<64x32xbf16>, vector<8x32xf32> -> vector<8x32xf32>
    %176 = vector.broadcast %11 : vector<1x32xf32> to vector<8x32xf32>
    %177 = arith.addf %175, %176 : vector<8x32xf32>
    %178 = arith.addf %177, %161 : vector<8x32xf32>
    %cst_72 = arith.constant dense<0.000000e+00> : vector<8xf32>
    %179 = vector.multi_reduction <add>, %178, %cst_72 [1] : vector<8x32xf32> to vector<8xf32>
    %180 = vector.shape_cast %179 : vector<8xf32> to vector<8x1xf32>
    %cst_73 = arith.constant 3.200000e+01 : f32
    %181 = vector.broadcast %cst_73 : f32 to vector<8x1xf32>
    %182 = arith.divf %180, %181 : vector<8x1xf32>
    %183 = vector.broadcast %182 : vector<8x1xf32> to vector<8x32xf32>
    %184 = arith.subf %178, %183 : vector<8x32xf32>
    %185 = arith.mulf %184, %184 : vector<8x32xf32>
    %cst_74 = arith.constant dense<0.000000e+00> : vector<8xf32>
    %186 = vector.multi_reduction <add>, %185, %cst_74 [1] : vector<8x32xf32> to vector<8xf32>
    %187 = vector.shape_cast %186 : vector<8xf32> to vector<8x1xf32>
    %cst_75 = arith.constant 3.200000e+01 : f32
    %188 = vector.broadcast %cst_75 : f32 to vector<8x1xf32>
    %189 = arith.divf %187, %188 : vector<8x1xf32>
    %190 = vector.broadcast %182 : vector<8x1xf32> to vector<8x32xf32>
    %191 = arith.subf %178, %190 : vector<8x32xf32>
    %cst_76 = arith.constant 9.99999974E-6 : f32
    %192 = vector.broadcast %cst_76 : f32 to vector<8x1xf32>
    %193 = arith.addf %189, %192 : vector<8x1xf32>
    %194 = math.rsqrt %193 : vector<8x1xf32>
    %195 = vector.broadcast %194 : vector<8x1xf32> to vector<8x32xf32>
    %196 = arith.mulf %191, %195 : vector<8x32xf32>
    %197 = vector.broadcast %12 : vector<1x32xf32> to vector<8x32xf32>
    %198 = arith.mulf %196, %197 : vector<8x32xf32>
    %199 = vector.broadcast %13 : vector<1x32xf32> to vector<8x32xf32>
    %200 = arith.addf %198, %199 : vector<8x32xf32>
    %c0_77 = arith.constant 0 : index
    %c0_78 = arith.constant 0 : index
    %201 = vector.load %arg13[%c0_77, %c0_78] : memref<8x32xf32, #tpu.memory_space<vmem>>, vector<8x32xf32>
    tpu.vector_store %arg13[%c0_77, %c0_78], %200 {strides = array<i32>} : memref<8x32xf32, #tpu.memory_space<vmem>>, vector<8x32xf32>,
    %c1_i32 = arith.constant 1 : i32
    %202 = arith.cmpi eq, %arg1, %c1_i32 : i32
    %203 = arith.extui %202 : i1 to i32
    %c0_i32_79 = arith.constant 0 : i32
    %204 = arith.cmpi ne, %203, %c0_i32_79 : i32
    scf.if %204 {
      %c0_80 = arith.constant 0 : index
      %c0_81 = arith.constant 0 : index
      %205 = vector.load %arg12[%c0_80, %c0_81] : memref<8x32xf32, #tpu.memory_space<vmem>>, vector<8x32xf32>
      tpu.vector_store %arg12[%c0_80, %c0_81], %200 {strides = array<i32>} : memref<8x32xf32, #tpu.memory_space<vmem>>, vector<8x32xf32>,
    } else {
    }
    return
  }
  func.func @transform_0(%arg0: i32, %arg1: i32) -> (i32, i32) {
    %c0_i32 = arith.constant 0 : i32
    %c0_i32_0 = arith.constant 0 : i32
    return %arg0, %c0_i32 : i32, i32
  }
  func.func @transform_1(%arg0: i32, %arg1: i32) -> (i32, i32, i32) {
    %c0_i32 = arith.constant 0 : i32
    %c0_i32_0 = arith.constant 0 : i32
    %c0_i32_1 = arith.constant 0 : i32
    return %arg0, %c0_i32, %c0_i32_0 : i32, i32, i32
  }
  func.func @transform_2(%arg0: i32, %arg1: i32) -> (i32, i32, i32) {
    %c0_i32 = arith.constant 0 : i32
    %c0_i32_0 = arith.constant 0 : i32
    %c0_i32_1 = arith.constant 0 : i32
    return %arg1, %c0_i32, %c0_i32_0 : i32, i32, i32
  }
  func.func @transform_3(%arg0: i32, %arg1: i32) -> (i32, i32, i32) {
    %c0_i32 = arith.constant 0 : i32
    %c0_i32_0 = arith.constant 0 : i32
    %c0_i32_1 = arith.constant 0 : i32
    return %arg1, %c0_i32, %c0_i32_0 : i32, i32, i32
  }
  func.func @transform_4(%arg0: i32, %arg1: i32) -> (i32, i32, i32) {
    %c0_i32 = arith.constant 0 : i32
    %c0_i32_0 = arith.constant 0 : i32
    %c0_i32_1 = arith.constant 0 : i32
    return %arg1, %c0_i32, %c0_i32_0 : i32, i32, i32
  }
  func.func @transform_5(%arg0: i32, %arg1: i32) -> (i32, i32, i32) {
    %c0_i32 = arith.constant 0 : i32
    %c0_i32_0 = arith.constant 0 : i32
    %c0_i32_1 = arith.constant 0 : i32
    return %arg1, %c0_i32, %c0_i32_0 : i32, i32, i32
  }
  func.func @transform_6(%arg0: i32, %arg1: i32) -> (i32, i32, i32) {
    %c0_i32 = arith.constant 0 : i32
    %c0_i32_0 = arith.constant 0 : i32
    %c0_i32_1 = arith.constant 0 : i32
    return %arg1, %c0_i32, %c0_i32_0 : i32, i32, i32
  }
  func.func @transform_7(%arg0: i32, %arg1: i32) -> (i32, i32, i32) {
    %c0_i32 = arith.constant 0 : i32
    %c0_i32_0 = arith.constant 0 : i32
    %c0_i32_1 = arith.constant 0 : i32
    return %arg1, %c0_i32, %c0_i32_0 : i32, i32, i32
  }
  func.func @transform_8(%arg0: i32, %arg1: i32) -> (i32, i32, i32) {
    %c0_i32 = arith.constant 0 : i32
    %c0_i32_0 = arith.constant 0 : i32
    %c0_i32_1 = arith.constant 0 : i32
    return %arg1, %c0_i32, %c0_i32_0 : i32, i32, i32
  }
  func.func @transform_9(%arg0: i32, %arg1: i32) -> (i32, i32, i32) {
    %c0_i32 = arith.constant 0 : i32
    %c0_i32_0 = arith.constant 0 : i32
    %c0_i32_1 = arith.constant 0 : i32
    return %arg1, %c0_i32, %c0_i32_0 : i32, i32, i32
  }
  func.func @transform_10(%arg0: i32, %arg1: i32) -> (i32, i32) {
    %c0_i32 = arith.constant 0 : i32
    %c0_i32_0 = arith.constant 0 : i32
    return %arg0, %c0_i32 : i32, i32
  }
}

</mosaic_0001>

<bundles_post_ra>
// kernel: tpu_custom_call.1
= control target key start
LH: loop header
LB: loop body
LE: loop exit
PB: predicated region body
PF: predicated region fallthrough
CT: control target
= control target key end

     0   :  { %s2939_s0 = inlined_call_operand.hbm [shape: f32[16,32], index: 0, kind: input, shape index: {}]   ;;  %s2940_s1 = inlined_call_operand.hbm [shape: f32[2,1,8], index: 1, kind: input, shape index: {}]   ;;  %s2941_s2 = inlined_call_operand.vmem [shape: bf16[2,32,32], index: 2, kind: input, shape index: {}]   ;;  %s2942_s3 = inlined_call_operand.vmem [shape: bf16[2,32,32], index: 3, kind: input, shape index: {}]   ;;  %s2943_s4 = inlined_call_operand.vmem [shape: bf16[2,32,32], index: 4, kind: input, shape index: {}]   ;;  %s2944_s5 = inlined_call_operand.vmem [shape: bf16[2,32,32], index: 5, kind: input, shape index: {}]   ;;  %s2945_s6 = inlined_call_operand.hbm [shape: bf16[2,32,64], index: 6, kind: input, shape index: {}]   ;;  %s2946_s7 = inlined_call_operand.vmem [shape: bf16[2,64,32], index: 7, kind: input, shape index: {}]   ;;  %s2947_s8 = inlined_call_operand.vmem [shape: f32[2,9,32], index: 8, kind: input, shape index: {}]   ;;  %s2948_s9 = inlined_call_operand.vmem [shape: f32[2,1,64], index: 9, kind: input, shape index: {}]   ;;  %s2949_s10 = inlined_call_operand.hbm [shape: f32[16,32], index: 10, kind: output, shape index: {}]  }
   0x1   :  { %2967 = sst [smem:[#allocation27_spill]] %s2939_s0 }
   0x2   :  { %2968 = sst [smem:[#allocation28_spill]] %s2940_s1 }
   0x3   :  { %2969 = sst [smem:[#allocation29_spill]] %s2941_s2 }
   0x4   :  { %2970 = sst [smem:[#allocation30_spill]] %s2942_s3 }
   0x5   :  { %2971 = sst [smem:[#allocation31_spill]] %s2943_s4 }
   0x6   :  { %2972 = sst [smem:[#allocation32_spill]] %s2944_s5 }
   0x7   :  { %2973 = sst [smem:[#allocation33_spill]] %s2945_s6 }
   0x8   :  { %2974 = sst [smem:[#allocation34_spill]] %s2946_s7 }
   0x9   :  { %2975 = sst [smem:[#allocation35_spill]] %s2947_s8 }
   0xa   :  { %2976 = sst [smem:[#allocation36_spill]] %s2948_s9 }
   0xb   :  { %2977 = sst [smem:[#allocation37_spill]] %s2949_s10 }
   0xc   :  { %15 = vsyncpa [#allocation5], 0 }
   0xd   :  { %17 = vsyncpa [#allocation5 + $0x1], 0 }
   0xe   :  { %18 = vsyncpa [#allocation8], 0 }
   0xf   :  { %20 = vsyncpa [#allocation8 + $0x1], 0 }
  0x10   :  { %21 = vsyncpa [#allocation6], 0 }
  0x11   :  { %23 = vsyncpa [#allocation6 + $0x1], 0  ;;  %s2402_s13 = smov 0   ;;  %s2404_s14 = smov 0  }
  0x12   :  { %s2406_s15 = smov 0   ;;  %s2408_s16 = smov 0  }
  0x13   :  { %s2410_s17 = smov 0   ;;  %s2412_s18 = smov 0  }
  0x14   :  { %s2414_s19 = smov 0   ;;  %s2416_s20 = smov 0  }
  0x15   :  { %s2418_s21 = smov 0   ;;  %s2420_s22 = smov 0  }
  0x16   :  { %s2422_s23 = smov 0  }
  0x17 LB: > { %2978 = sst [smem:[#allocation15_spill]] %s2303_s16  ;;  %s2458_s24 = sadd.s32 4294967295, %s2331_s23   ;;  %s2331_s23 = sphi %s2422_s23, %s29_s23   ;;  %s2327_s22 = sphi %s2420_s22, %s3033_s22   ;;  %s2323_s21 = sphi %s2418_s21, %s3032_s21   ;;  %s2319_s20 = sphi %s2416_s20, %s3031_s20   ;;  %s2315_s19 = sphi %s2414_s19, %s3030_s19   ;;  %s2311_s18 = sphi %s2412_s18, %s3029_s18   ;;  %s2307_s17 = sphi %s2410_s17, %s3038_s17   ;;  %s2303_s16 = sphi %s2408_s16, %s3037_s16   ;;  %s2299_s15 = sphi %s2406_s15, %s3036_s15   ;;  %s2295_s14 = sphi %s2404_s14, %s3035_s14   ;;  %s2291_s13 = sphi %s2402_s13, %s3034_s13  }
  0x18   : > { %2979 = sst [smem:[#allocation16_spill]] %s2311_s18  ;;  %s1750_s25 = sadd.s32 4294967294, %s2331_s23  }
  0x19   : > { %2980 = sst [smem:[#allocation17_spill]] %s2319_s20  ;;  %s38_s26 = sadd.s32 1, %s2323_s21 }
  0x1a   : > { %2981 = sst [smem:[#allocation18_spill]] %s2323_s21  ;;  %s41_s27 = sadd.s32 1, %s2327_s22 }
  0x1b   : > { %2982 = sst [smem:[#allocation19_spill]] %s2327_s22  ;;  %p39_p0 = scmp.ge.s32.totalorder %s38_s26, 2 }
  0x1c   : > { %2983 = sst [smem:[#allocation20_spill]] %s2331_s23  ;;  %s48_s28 = sadd.s32 1, %s2311_s18 }
  0x1d   : > { %p55_p1 = scmp.ne.s32.totalorder %s2311_s18, %s2307_s17  ;;  %p56_p2 = scmp.eq.s32.totalorder %s2331_s23, 0 }
  0x1e   : > { %s3040_s26 = smov (%p39_p0, %s38_s26), 0  ;;  %s3042_s27 = smov (!%p39_p0, %s41_s27), %s2327_s22 }
  0x1f   : > { %2984 = sst [smem:[#allocation21_spill]] %s3040_s26  ;;  %p2475_p3 = por %p56_p2, %p55_p1 }
  0x20   : > { %p2952_p4 = scmp.ne.s32.totalorder %s2307_s17, %s2303_s16  ;;  %p43_p5 = scmp.ge.s32.totalorder %s3042_s27, 2 }
  0x21   : > { %p62_p6 = scmp.eq.s32.totalorder %s2458_s24, 0  ;;  %s201_s30 = ssub.s32 %s2323_s21, %s3040_s26 }
  0x22   : > { %s204_s11 = sadd.s32 1, %s2299_s15  ;;  %s3044_s27 = smov (%p43_p5, %s3042_s27), 0 }
  0x23   : > { %2986 = sst [smem:[#allocation22_spill]] %s3044_s27  ;;  %p2492_p7 = por %p62_p6, %p2952_p4 }
  0x24   : > { %p202_p8 = scmp.eq.s32.totalorder %s201_s30, 0  ;;  %s45_s26 = ssub.s32 %s2327_s22, %s3044_s27 }
  0x25   : > { %s2987_s12 = scalar_select %p2492_p7, 1, 0 }
  0x26   : > { %p211_p9 = scmp.ne.s32.totalorder %s2299_s15, %s2295_s14  ;;  %p46_p10 = scmp.eq.s32.totalorder %s45_s26, 0 }
  0x27   : > { %p217_p11 = scmp.ne.s32.totalorder %s2295_s14, %s2291_s13  ;;  %p319_p0 = scmp.eq.s32.totalorder %s2458_s24, 3 }
  0x28   : > { %s2503_s10 = scalar_select %p202_p8, %s2299_s15, %s204_s11  }
  0x29   : > { %s2506_s20 = scalar_select %p46_p10, %s2311_s18, %s48_s28  }
  0x2a   : > { %2988 = sst [smem:[#allocation23_spill]] %s2503_s10  ;;  %p2510_p12 = por %p211_p9, %p56_p2 }
  0x2b   : > { %2989 = sst [smem:[#allocation24_spill]] %s2506_s20  ;;  %p2516_p13 = por %p217_p11, %p62_p6 }
  0x2c   : > { %p325_p5 = scmp.eq.s32.totalorder %s1750_s25, 3  ;;  %p2960_p4 = scmp.lt.s32.totalorder %s2331_s23, 4 }
  0x2d   : > { %s2991_s8 = scalar_select %p2516_p13, 1, 0 }
  0x2e   : > { %p2525_p7 = por %p319_p0, %p55_p1  ;;  %p2994_p8 = scmp.ne.s32.totalorder %s2307_s17, %s2303_s16 }
  0x2f   : > { %s2537_s28 = sand.u32 1, %s2311_s18   ;;  %p2543_p2 = pnand %p2960_p4, %p2475_p3 }
  0x30   : > { %s2992_s13 = scalar_select %p2525_p7, 1, 0 }
  0x31   : > { %p2532_p10 = por %p325_p5, %p2994_p8  ;;  %s363_s25 = sand.u32 1, %s2331_s23  }
  0x32   : > { %2993 = sst [smem:[#allocation25_spill]] %s2992_s13  ;;  %s1755_s11 = sshll.u32 %s2327_s22, 4 }
  0x33   : > { %s2995_s26 = scalar_select %p2532_p10, 1, 0 }
  0x34   : > { %s366_s27 = scalar_lea.vmem [#allocation7], %s2537_s28  ;;  %s2998_s1 = sld [smem:[#allocation28_spill]] }
  0x35   : > { %2996 = sst [smem:[#allocation26_spill]] %s2995_s26  ;;  %s373_s20 = sshll.u32 %s366_s27, 4  ;;  %s2555_s20 = int_to_ptr.vmem [resolvable:$true] %s373_s20 }
  0x36   : > { %s2557_s29 = scalar_lea.sflag [#allocation8], %s363_s25  ;;  %p2113_p3 = pneg %p2543_p2 }
  0x3a   : > { %s2553_s13 = scalar_lea.hbm %s2998_s1, %s1755_s11  ;;  %s2116_s16 = scalar_lea.hbm %s2998_s1, 32 }
  0x3b   : > { %s2111_s18 = scalar_lea.hbm %s2553_s13, 16  ;;  %p2117_p11 = scmp.lt.u32.totalorder %s2553_s13, %s2998_s1 }
  0x3c   : > { %p2112_p1 = scmp.ne.s32.totalorder %s2553_s13, %s2111_s18  ;;  %p2118_p0 = scmp.lt.u32.totalorder %s2116_s16, %s2111_s18 }
  0x3d   : > { %p2120_p8 = scmp.lt.u32.totalorder %s2111_s18, %s2553_s13 }
  0x3e   : > { %p2114_p6 = pnand %p2113_p3, %p2112_p1  ;;  %p2119_p5 = por %p2118_p0, %p2117_p11 }
  0x40   : > { %p2115_p9 = pneg %p2114_p6  ;;  %p2121_p4 = por %p2120_p8, %p2119_p5 }
  0x42   : > { %p2122_p10 = pnand %p2121_p4, %p2115_p9 }
  0x44   : > { %2125 = shalt.err (!%p2122_p10)
}
  0x45   : > { %s2126_s25 = scalar_lea.vmem %s2555_s20, 16  ;;  %s2333_s27 = smov [#allocation7]  }
  0x46   : > { %p2127_p1 = scmp.ne.s32.totalorder %s2555_s20, %s2126_s25  ;;  %s2131_s10 = sshll.u32 %s2333_s27, 4  ;;  %s2132_s10 = int_to_ptr.vmem [resolvable:$false] %s2131_s10 }
  0x47   : > { %s2133_s26 = scalar_lea.vmem %s2132_s10, 32  ;;  %p2134_p13 = scmp.lt.s32.totalorder %s2555_s20, %s2132_s10 }
  0x48   : > { %p2129_p6 = pnand %p2127_p1, %p2113_p3  ;;  %p2135_p11 = scmp.lt.s32.totalorder %s2133_s26, %s2126_s25 }
  0x4a   : > { %p2130_p7 = pneg %p2129_p6  ;;  %p2136_p0 = por %p2135_p11, %p2134_p13 }
  0x4c   : > { %p2137_p5 = pnand %p2136_p0, %p2130_p7 }
  0x4e   : > { %2140 = shalt.err (!%p2137_p5)
}
  0x4f   : > { %1969 = dma.hbm_to_vmem [thread:$0]  (!%p2543_p2), %s2553_s13, 16, %s2555_s20, %s2557_s29  }
  0x50   : > { %p2999_p4 = scmp.lt.s32.totalorder %s2331_s23, 4  ;;  %p1759_p7 = scmp.ge.s32.totalorder %s2331_s23, 1 }
  0x51   : > { %p453_p10 = scmp.lt.s32.totalorder %s2331_s23, 5  ;;  %s1753_s11 = sshll.u32 %s2537_s28, 3 }
  0x52   : > { %p2589_p13 = pnand %p2999_p4, %p2510_p12  ;;  %s1754_s25 = sshll.u32 %s2327_s22, 7 }
  0x53   : > { %p2595_p9 = pnand %p1759_p7, %p453_p10  ;;  %s3002_s0 = sld [smem:[#allocation27_spill]] }
  0x54   : > { %s349_s9 = scalar_lea.vmem [#allocation4], %s1753_s11  ;;  %s414_s13 = sand.u32 1, %s2299_s15  }
  0x55   : > { %s3001_s16 = scalar_select %p2595_p9, 1, 0 }
  0x56   : > { %s356_s20 = sshll.u32 %s349_s9, 4  ;;  %s2609_s1 = sshll.u32 %s414_s13, 4  ;;  %s2607_s20 = int_to_ptr.vmem [resolvable:$true] %s356_s20 }
  0x57   : > { %s346_s23 = scalar_lea.sflag [#allocation5], %s2537_s28 }
  0x59   : > { %s2604_s26 = scalar_lea.hbm %s3002_s0, %s1754_s25  ;;  %s2146_s10 = scalar_lea.hbm %s3002_s0, 256 }
  0x5a   : > { %s2141_s7 = scalar_lea.hbm %s2604_s26, 128  ;;  %p2147_p6 = scmp.lt.u32.totalorder %s2604_s26, %s3002_s0 }
  0x5b   : > { %p2142_p12 = scmp.ne.s32.totalorder %s2604_s26, %s2141_s7  ;;  %p2148_p11 = scmp.lt.u32.totalorder %s2146_s10, %s2141_s7 }
  0x5c   : > { %p2150_p5 = scmp.lt.u32.totalorder %s2141_s7, %s2604_s26 }
  0x5d   : > { %p2144_p8 = pnand %p2142_p12, %p2113_p3  ;;  %p2149_p0 = por %p2148_p11, %p2147_p6 }
  0x5f   : > { %p2145_p1 = pneg %p2144_p8  ;;  %p2151_p4 = por %p2150_p5, %p2149_p0 }
  0x61   : > { %p2152_p7 = pnand %p2151_p4, %p2145_p1 }
  0x63   : > { %2155 = shalt.err (!%p2152_p7)
}
  0x64   : > { %s2156_s28 = scalar_lea.vmem %s2607_s20, 128  ;;  %s2334_s11 = smov [#allocation4]  }
  0x65   : > { %p2157_p10 = scmp.ne.s32.totalorder %s2607_s20, %s2156_s28  ;;  %s2161_s9 = sshll.u32 %s2334_s11, 4  ;;  %s2162_s9 = int_to_ptr.vmem [resolvable:$false] %s2161_s9 }
  0x66   : > { %s2163_s5 = scalar_lea.vmem %s2162_s9, 256  ;;  %p2164_p9 = scmp.lt.s32.totalorder %s2607_s20, %s2162_s9 }
  0x67   : > { %p2159_p12 = pnand %p2157_p10, %p2113_p3  ;;  %p2165_p6 = scmp.lt.s32.totalorder %s2163_s5, %s2156_s28 }
  0x69   : > { %p2160_p8 = pneg %p2159_p12  ;;  %p2166_p11 = por %p2165_p6, %p2164_p9 }
  0x6b   : > { %p2167_p0 = pnand %p2166_p11, %p2160_p8 }
  0x6d   : > { %2170 = shalt.err (!%p2167_p0)
}
  0x6e   : > { %1966 = dma.hbm_to_vmem [thread:$0]  (!%p2543_p2), %s2604_s26, 128, %s2607_s20, %s346_s23  }
  0x6f   : > { %s1812_s7 = sshll.u32 %s2323_s21, 8  ;;  %s3003_s6 = sld [smem:[#allocation33_spill]] }
  0x70   : > { %s416_s27 = scalar_lea.vmem [#allocation9], %s2609_s1  ;;  %p2173_p9 = pneg %p2589_p13 }
  0x71   : > { %s423_s10 = sshll.u32 %s416_s27, 4  ;;  %s2642_s10 = int_to_ptr.vmem [resolvable:$true] %s423_s10 }
  0x75   : > { %s2639_s25 = scalar_lea.hbm %s3003_s6, %s1812_s7  ;;  %s2176_s20 = scalar_lea.hbm %s3003_s6, 512 }
  0x76   : > { %s2171_s30 = scalar_lea.hbm %s2639_s25, 256  ;;  %p2177_p5 = scmp.lt.u32.totalorder %s2639_s25, %s3003_s6 }
  0x77   : > { %p2172_p3 = scmp.ne.s32.totalorder %s2639_s25, %s2171_s30  ;;  %p2178_p4 = scmp.lt.u32.totalorder %s2176_s20, %s2171_s30 }
  0x78   : > { %p2180_p10 = scmp.lt.u32.totalorder %s2171_s30, %s2639_s25 }
  0x79   : > { %p2174_p2 = pnand %p2173_p9, %p2172_p3  ;;  %p2179_p7 = por %p2178_p4, %p2177_p5 }
  0x7b   : > { %p2175_p1 = pneg %p2174_p2  ;;  %p2181_p12 = por %p2180_p10, %p2179_p7 }
  0x7d   : > { %p2182_p8 = pnand %p2181_p12, %p2175_p1 }
  0x7f   : > { %2185 = shalt.err (!%p2182_p8)
}
  0x80   : > { %s2186_s1 = scalar_lea.vmem %s2642_s10, 256  ;;  %s2335_s9 = smov [#allocation9]  }
  0x81   : > { %p2187_p6 = scmp.ne.s32.totalorder %s2642_s10, %s2186_s1  ;;  %s2191_s5 = sshll.u32 %s2335_s9, 4  ;;  %s2192_s5 = int_to_ptr.vmem [resolvable:$false] %s2191_s5 }
  0x82   : > { %s2193_s7 = scalar_lea.vmem %s2192_s5, 512  ;;  %p2194_p3 = scmp.lt.s32.totalorder %s2642_s10, %s2192_s5 }
  0x83   : > { %p2189_p11 = pnand %p2187_p6, %p2173_p9  ;;  %p2195_p2 = scmp.lt.s32.totalorder %s2193_s7, %s2186_s1 }
  0x85   : > { %p2190_p0 = pneg %p2189_p11  ;;  %p2196_p5 = por %p2195_p2, %p2194_p3 }
  0x87   : > { %p2197_p4 = pnand %p2196_p5, %p2190_p0 }
  0x89   : > { %2200 = shalt.err (!%p2197_p4)
}
  0x8a   : > { %s2336_s22 = smov 64   ;;  %s2337_s13 = smov 4  }
  0x8b   : > { %1972 = dma.hbm_to_vmem [thread:$0]  (!%p2589_p13), %s2639_s25, 256, %s2642_s10, %s2557_s29, %s2336_s22, %s2336_s22, %s2337_s13  }
  0x8c   : > { %p3004_p9 = scmp.ne.s32.totalorder %s3001_s16, 0 }
  0x8d   : > { %s2673_s27 = sand.u32 (!%p3004_p9), 1, %s2307_s17   ;;  %p3005_p1 = scmp.ne.s32.totalorder (!%p3004_p9), %s2987_s12, 0 }
  0x8e   : > { %457 = sbr.rel (%p3004_p9) target bundleno = 2711 (0xa97), region = 60  ;;  %s1760_s30 = sshll.u32 (!%p3004_p9), %s2673_s27, 3 }
  0x8f   : > { %s460_s23 = scalar_lea.sflag (!%p3004_p9), [#allocation5], %s2673_s27  ;;  %s463_s26 = scalar_lea.vmem (!%p3004_p9), [#allocation4], %s1760_s30 }
  0x95   : > { %2274 = dma.done.wait (%p3005_p1), %s460_s23, 128  }
  0x96   : > { %2276 = vsyncadd (%p3005_p1), %s460_s23, 4294967168  ;;  %s468_s29 = sand.u32 1, %s2458_s24  }
  0x97   : > { %s469_s18 = scalar_lea.sflag [#allocation8], %s468_s29 }
  0x98   : > { %2278 = dma.done.wait (%p3005_p1), %s469_s18, 16  }
  0x99   : > { %2280 = vsyncadd (%p3005_p1), %s469_s18, 4294967280  ;;  %s478_s25 = sand.u32 1, %s2295_s14   ;;  %p3006_p13 = scmp.ne.s32.totalorder %s2991_s8, 0 }
  0x9a   : > { %s2688_s10 = sshll.u32 %s478_s25, 4 }
  0x9b   : > { %2282 = dma.done.wait (%p3006_p13), %s469_s18, 256  }
  0x9c   : > { %2284 = vsyncadd (%p3006_p13), %s469_s18, 4294967040  ;;  %p559_p7 = scmp.lt.s32.totalorder %s2315_s19, 1  ;;  %s3007_s2 = sld [smem:[#allocation29_spill]] }
  0x9d   : > { %s3008_s3 = sld [smem:[#allocation30_spill]]  ;;  %s3009_s4 = sld [smem:[#allocation31_spill]] }
  0x9e   : > { %s2697_s24 = scalar_select %p559_p7, %s2315_s19, 1 }
  0x9f   : > { %s3010_s25 = sld [smem:[#allocation32_spill]]  ;;  %s3011_s6 = sld [smem:[#allocation34_spill]] }
  0xa0   : > { %s1813_s12 = sshll.u32 %s2697_s24, 4  ;;  %s1817_s28 = sshll.u32 %s2697_s24, 5 }
  0xa1   : > { %s3013_s8 = sld [smem:[#allocation36_spill]]  ;;  %p1775_p10 = scmp.ne.s32.totalorder %s2315_s19, 0 }
  0xa2   : > { %s563_s9 = scalar_lea.vmem %s3007_s2, %s1813_s12  ;;  %s3012_s2 = sld [smem:[#allocation35_spill]]  ;;  %v597_v0 = vld [vmem:[%s463_s26] sm:$0xff] (!%p1775_p10)  ;;  %vm598_vm0 = vcmask (!%p1775_p10), 261120  }
  0xa3   : > { %s568_s22 = scalar_lea.vmem %s3008_s3, %s1813_s12  ;;  %s2710_s23 = scalar_lea.vmem %s3009_s4, %s1813_s12  ;;  %599 = vst.msk [vmem:[#allocation2] sm:$0xff] (!%p1775_p10), %vm598_vm0, %v597_v0 }
  0xa4   : > { %s2731_s4 = scalar_lea.vmem [#allocation10], %s1760_s30  ;;  %596 = sbr.rel (%p1775_p10) target bundleno = 171 (0xab), region = 76 }
  0xa5   : > { %s2715_s20 = scalar_lea.vmem %s3010_s25, %s1813_s12  ;;  %s2720_s21 = scalar_lea.vmem %s3011_s6, %s1817_s28 }
  0xa7   : > { %s591_s13 = scalar_lea.vmem %s3013_s8, %s2697_s24 }
  0xa8   : > { %s2725_s5 = scalar_lea.vmem %s3012_s2, %s1813_s12 }
  0xab PF: > { %v2077_v1 = vld [vmem:[%s568_s22] sm:$0xff]   ;;  %v2338_v2 = vmov 0.0   ;;  %v2079_v4 = vld [vmem:[%s568_s22 + $0x8] sm:$0xff]   ;;  %vm2339_vm1 = vmmov 0   ;;  %vm624_vm2 = vcmask 261120   ;;  %v608_v8 = vlaneseq  ;;  %s2340_s0 = smov 112  }
  0xac   : > { %1863 = vmatprep.subr.bf16.mxu1 %v2338_v2  ;;  %1855 = vmatprep.subr.bf16.mxu0 %v2338_v2  ;;  %v2078_v3 = vld [vmem:[%s563_s9] sm:$0xff]   ;;  %v2080_v6 = vld [vmem:[%s563_s9 + $0x8] sm:$0xff]   ;;  %vm792_vm3 = vcmask 64512   ;;  %s2341_s2 = smov 120   ;;  %s2342_s3 = smov 104   ;;  %vm862_vm4 = vcmask 1043456  }
  0xad   : > { %1864 = vmatpush3.bf16.msra.mxu1 %v2077_v1  ;;  %1867 = vmatprep.mubr.msk.bf16.mxu1 %vm2339_vm1, %v2338_v2  ;;  %v2739_v5 = vld [vmem:[#allocation2] sm:$0xff]  ;;  %v2754_v9 = vshrl.u32 %v608_v8, 7  ;;  %v2082_v29 = vld [vmem:[%s2710_s23 + $0x8] sm:$0xff]   ;;  %s3014_s6 = scalar_lea.vmem [#allocation7], %s2673_s27  ;;  %s2343_s30 = smov 8   ;;  %vm1026_vm5 = vcmask 130112  }
  0xae   : > { %1865 = vmatprep.subr.bf16.mxu1 %v2338_v2  ;;  %1856 = vmatpush3.bf16.msra.mxu0 %v2078_v3  ;;  %v603_v7 = vpack.c.bf16 %v2739_v5, %v2739_v5  ;;  %v2758_v11 = vld [vmem:[%s2725_s5] sm:$0xff]  ;;  %s2344_s26 = smov 16   ;;  %s2345_s16 = smov 24   ;;  %vm1144_vm6 = vcmask 195712   ;;  %vm1262_vm7 = vcmask 261312   ;;  %vm1459_vm8 = vcmask 523264  }
  0xaf   : > { %1857 = vmatprep.subr.bf16.mxu0 %v2338_v2  ;;  %1859 = vmatprep.mubr.msk.bf16.mxu0 %vm2339_vm1, %v2338_v2  ;;  %v674_v10 = vsub.s32 1, %v2754_v9  ;;  %v610_v12 = vsub.s32 0, %v2754_v9  ;;  %v2081_v28 = vld [vmem:[%s2710_s23] sm:$0xff]   ;;  %v734_v47 = vsub.s32 2, %v2754_v9  ;;  %p1807_p12 = scmp.ne.s32.totalorder %s2315_s19, 1 }
  0xb0   : > { %v1786_v40 = vld [vmem:[%s3014_s6] ss:$0 sm:$0xff] }
  0xb1   : > { %1866 = vmatpush3.bf16.msra.mxu1 %v2079_v4  ;;  %v675_v13 = vrot.slane %v2758_v11, %v674_v10  ;;  %v611_v14 = vrot.slane %v2758_v11, %v610_v12  ;;  %v735_v48 = vrot.slane %v2758_v11, %v734_v47 }
  0xb2   : > { %1858 = vmatpush3.bf16.msra.mxu0 %v2080_v6  ;;  %1879 = vmatprep.subr.bf16.mxu1 %v2338_v2 }
  0xb3   : > { %1871 = vmatprep.subr.bf16.mxu0 %v2338_v2 }
  0xb4   : > { %1868 = vmatmul.mubr.msk.bf16.vlgmr.msra.gmra.mrb[0].mxu1 %vm624_vm2, %v603_v7 }
  0xb5   : > { %1860 = vmatmul.mubr.msk.bf16.vlgmr.msra.gmra.mrb[0].mxu0 %vm624_vm2, %v603_v7  ;;  %1881 = vmatprep.mubr.msk.bf16.mxu1 %vm2339_vm1, %v2338_v2 }
  0xb6   : > { %1875 = vmatprep.mubr.msk.bf16.mxu0 %vm2339_vm1, %v2338_v2  ;;  %1872 = vmatpush3.bf16.msra.mxu0 %v2081_v28 }
  0xb7   : > { %1873 = vmatprep.subr.bf16.mxu0 %v2338_v2 }
  0xba   : > { %1874 = vmatpush3.bf16.msra.mxu0 %v2082_v29 }
  0xbb   : > { %1885 = vmatprep.subr.bf16.mxu0 %v2338_v2 }
  0xbd   : > { %1876 = vmatmul.mubr.msk.bf16.vlgmr.msra.gmra.mrb[4].mxu0 %vm624_vm2, %v603_v7 }
  0xbe   : > { %1887 = vmatprep.mubr.msk.bf16.mxu0 %vm2339_vm1, %v2338_v2 }
 0x187   : > { %v722_v15 = vpop.f32.mrb[0].mxu1 }
 0x188   : > { %v723_v16 = vadd.f32 %v722_v15, %v675_v13  ;;  %v1869_v17 = vpop.f32.mrb[1].mxu1  ;;  %v662_v18 = vpop.f32.mrb[0].mxu0 }
 0x189   : > { %v725_v19 = vpop.f32.mrb[2].mxu1  ;;  %v663_v20 = vadd.f32 %v662_v18, %v611_v14  ;;  %v1861_v21 = vpop.f32.mrb[1].mxu0 }
 0x18a   : > { %v790_v22 = vpack.c.bf16 %v723_v16, %v723_v16  ;;  %v1870_v23 = vpop.f32.mrb[3].mxu1  ;;  %v665_v24 = vpop.f32.mrb[2].mxu0 }
 0x18b   : > { %v1862_v25 = vpop.f32.mrb[3].mxu0  ;;  %v789_v26 = vpack.c.bf16 %v663_v20, %v663_v20 }
 0x18c   : > { %1030 = vrot.lane.b32.xlu1 %v790_v22, %s2340_s0  ;;  %911 = vrot.lane.b32.xlu0 %v790_v22, %s2341_s2  ;;  %v797_v27 = vsel %vm792_vm3, %v790_v22, 0 }
 0x18d   : > { %1880 = vmatpush3.bf16.xpose.msra.mxu1 %v797_v27 }
 0x18e   : > { %1891 = vmatprep.subr.bf16.mxu1 %v2338_v2 }
 0x190   : > { %1028 = vrot.lane.b32.xlu1 %v789_v26, %s2340_s0  ;;  %908 = vrot.lane.b32.xlu0 %v789_v26, %s2341_s2  ;;  %v782_v49 = vpop.f32.mrb[4].mxu0 }
 0x191   : > { %v783_v50 = vadd.f32 %v782_v49, %v735_v48  ;;  %v1877_v51 = vpop.f32.mrb[5].mxu0 }
 0x192   : > { %v785_v52 = vpop.f32.mrb[6].mxu0 }
 0x193   : > { %v791_v53 = vpack.c.bf16 %v783_v50, %v783_v50  ;;  %v1878_v54 = vpop.f32.mrb[7].mxu0 }
 0x194   : > { %1146 = vrot.lane.b32.xlu1 %v789_v26, %s2342_s3  ;;  %1148 = vrot.lane.b32.xlu0 %v790_v22, %s2342_s3 }
 0x195   : > { %1882 = vmatmul.mubr.msk.bf16.vlgmr.msra.gmra.mrb[4].mxu1 %vm792_vm3, %v789_v26  ;;  %v864_v55 = vsel %vm862_vm4, %v791_v53, 0 }
 0x196   : > { %1893 = vmatprep.mubr.msk.bf16.mxu1 %vm2339_vm1, %v2338_v2  ;;  %1886 = vmatpush3.bf16.msra.mxu0 %v864_v55 }
 0x197   : > { %1897 = vmatprep.subr.bf16.mxu0 %v2338_v2 }
 0x1fe   : > { %v912_v30 = vpop.permute.xlu0 %911  ;;  %v1031_v32 = vpop.permute.xlu1 %1030 }
 0x1ff   : > { %v917_v31 = vsel %vm792_vm3, %v912_v30, 0  ;;  %v1036_v34 = vsel %vm792_vm3, %v1031_v32, 0 }
 0x200   : > { %1892 = vmatpush3.bf16.xpose.msra.mxu1 %v917_v31 }
 0x201   : > { %1903 = vmatprep.subr.bf16.mxu1 %v2338_v2 }
 0x202   : > { %v909_v33 = vpop.permute.xlu0 %908  ;;  %v1029_v36 = vpop.permute.xlu1 %1028 }
 0x206   : > { %v1149_v35 = vpop.permute.xlu0 %1148  ;;  %v1147_v38 = vpop.permute.xlu1 %1146 }
 0x207   : > { %1894 = vmatmul.mubr.msk.bf16.vlgmr.msra.gmra.mrb[8].mxu1 %vm792_vm3, %v909_v33  ;;  %v1154_v37 = vsel %vm792_vm3, %v1149_v35, 0 }
 0x208   : > { %1904 = vmatpush3.bf16.xpose.msra.mxu1 %v1036_v34  ;;  %1905 = vmatprep.mubr.msk.bf16.mxu1 %vm2339_vm1, %v2338_v2 }
 0x209   : > { %1915 = vmatprep.subr.bf16.mxu1 %v2338_v2 }
 0x20f   : > { %1906 = vmatmul.mubr.msk.bf16.vlgmr.msra.gmra.mrb[12].mxu1 %vm792_vm3, %v1029_v36 }
 0x210   : > { %1916 = vmatpush3.bf16.xpose.msra.mxu1 %v1154_v37  ;;  %1917 = vmatprep.mubr.msk.bf16.mxu1 %vm2339_vm1, %v2338_v2 }
 0x211   : > { %1927 = vmatprep.subr.bf16.mxu1 %v2338_v2 }
 0x217   : > { %1918 = vmatmul.mubr.msk.bf16.vlgmr.msra.gmra.mrb[16].mxu1 %vm792_vm3, %v1147_v38 }
 0x218   : > { %1931 = vmatprep.mubr.msk.bf16.mxu1 %vm2339_vm1, %v2338_v2 }
 0x268   : > { %v833_v39 = vpop.f32.mrb[4].mxu1 }
 0x269   : > { %v839_v41 = vmul.f32 0.35355338, %v833_v39  ;;  %v1883_v42 = vpop.f32.mrb[5].mxu1 }
 0x26a   : > { %v836_v43 = vpop.f32.mrb[6].mxu1 }
 0x26b   : > { %v1884_v44 = vpop.f32.mrb[7].mxu1  ;;  %v846_v45 = vadd.f32 %v1786_v40, %v839_v41 }
 0x26d   : > { %v847_v46 = vsel %vm792_vm3, %v846_v45, -inf }
 0x26e   : > { %848 = vmax.xlane.f32.xlu0 %v847_v46 }
 0x2da   : > { %v953_v56 = vpop.f32.mrb[8].mxu1 }
 0x2db   : > { %v959_v57 = vmul.f32 0.35355338, %v953_v56  ;;  %v1895_v58 = vpop.f32.mrb[9].mxu1 }
 0x2dc   : > { %v956_v59 = vpop.f32.mrb[10].mxu1 }
 0x2dd   : > { %v1896_v60 = vpop.f32.mrb[11].mxu1  ;;  %v960_v61 = vadd.f32 %v1786_v40, %v959_v57 }
 0x2df   : > { %v961_v62 = vsel %vm792_vm3, %v960_v61, -inf }
 0x2e0   : > { %962 = vmax.xlane.f32.xlu1 %v961_v62 }
 0x2e2   : > { %v1072_v63 = vpop.f32.mrb[12].mxu1 }
 0x2e3   : > { %v1078_v0 = vmul.f32 0.35355338, %v1072_v63  ;;  %v1907_v1 = vpop.f32.mrb[13].mxu1 }
 0x2e4   : > { %v1075_v3 = vpop.f32.mrb[14].mxu1 }
 0x2e5   : > { %v1908_v4 = vpop.f32.mrb[15].mxu1  ;;  %v1079_v6 = vadd.f32 %v1786_v40, %v1078_v0 }
 0x2e6   : > { %v2083_v4 = vld [vmem:[%s2715_s20] sm:$0xff]  }
 0x2e7   : > { %v1080_v7 = vsel %vm792_vm3, %v1079_v6, -inf  ;;  %1928 = vmatpush3.bf16.msra.mxu1 %v2083_v4 }
 0x2e8   : > { %1081 = vmax.xlane.f32.xlu0 %v1080_v7  ;;  %1929 = vmatprep.subr.bf16.mxu1 %v2338_v2 }
 0x2ea   : > { %v1190_v8 = vpop.f32.mrb[16].mxu1 }
 0x2eb   : > { %v1196_v10 = vmul.f32 0.35355338, %v1190_v8  ;;  %v1919_v12 = vpop.f32.mrb[17].mxu1 }
 0x2ec   : > { %v1193_v13 = vpop.f32.mrb[18].mxu1 }
 0x2ed   : > { %v1920_v14 = vpop.f32.mrb[19].mxu1  ;;  %v1197_v15 = vadd.f32 %v1786_v40, %v1196_v10 }
 0x2ef   : > { %v1198_v16 = vsel %vm792_vm3, %v1197_v15, -inf }
 0x2f0   : > { %1199 = vmax.xlane.f32.xlu0 %v1198_v16 }
 0x2fb   : > { %v849_v17 = vpop.xlane.xlu0 %848 }
 0x2fc   : > { %v850_v18 = vsub.f32 %v846_v45, %v849_v17 }
 0x2fe   : > { %v851_v19 = vmul.f32 1.442695, %v850_v18 }
 0x300   : > { %2091 = vpow2.f32 %v851_v19 }
 0x30a   : > { %v2092_v20 = vpop.eup %2091 }
 0x30b   : > { %v853_v21 = vsel %vm792_vm3, %v2092_v20, 0.0 }
 0x30c   : > { %854 = vadd.xlane.f32.xlu1 %v853_v21 }
 0x31d   : > { %974 = vrot.lane.b32.xlu1 %v791_v53, %s2341_s2 }
 0x36d   : > { %v963_v22 = vpop.xlane.xlu1 %962 }
 0x36e   : > { %v964_v23 = vsub.f32 %v960_v61, %v963_v22  ;;  %v1272_v22 = vsub.s32 3, %v2754_v9 }
 0x370   : > { %v965_v24 = vmul.f32 1.442695, %v964_v23  ;;  %v1273_v23 = vrot.slane %v2758_v11, %v1272_v22 }
 0x372   : > { %2093 = vpow2.f32 %v965_v24 }
 0x375   : > { %v1082_v25 = vpop.xlane.xlu0 %1081 }
 0x376   : > { %v1083_v26 = vsub.f32 %v1079_v6, %v1082_v25  ;;  %v2084_v6 = vld [vmem:[%s2715_s20 + $0x8] sm:$0xff]   ;;  %s3015_s20 = scalar_lea.vmem [#allocation9], %s2688_s10 }
 0x377   : > { %1930 = vmatpush3.bf16.msra.mxu1 %v2084_v6  ;;  %s3016_s12 = smov %s3015_s20 }
 0x378   : > { %v1084_v27 = vmul.f32 1.442695, %v1083_v26  ;;  %1943 = vmatprep.subr.bf16.mxu1 %v2338_v2 }
 0x37a   : > { %2095 = vpow2.f32 %v1084_v27 }
 0x37c   : > { %v2094_v28 = vpop.eup %2093 }
 0x37d   : > { %v1200_v29 = vpop.xlane.xlu0 %1199  ;;  %v967_v30 = vsel %vm792_vm3, %v2094_v28, 0.0 }
 0x37e   : > { %v1201_v31 = vsub.f32 %v1197_v15, %v1200_v29  ;;  %968 = vadd.xlane.f32.xlu0 %v967_v30 }
 0x380   : > { %v1202_v32 = vmul.f32 1.442695, %v1201_v31 }
 0x382   : > { %2097 = vpow2.f32 %v1202_v32 }
 0x384   : > { %v2096_v33 = vpop.eup %2095 }
 0x385   : > { %v1086_v34 = vsel %vm792_vm3, %v2096_v33, 0.0 }
 0x386   : > { %1087 = vadd.xlane.f32.xlu1 %v1086_v34 }
 0x38c   : > { %v2098_v35 = vpop.eup %2097 }
 0x38d   : > { %v1204_v36 = vsel %vm792_vm3, %v2098_v35, 0.0 }
 0x38e   : > { %1205 = vadd.xlane.f32.xlu0 %v1204_v36  ;;  %v2085_v36 = vld [vmem:[%s3015_s20] sm:$0xff]  }
 0x397   : > { %1210 = vrot.lane.b32.xlu1 %v791_v53, %s2342_s3 }
 0x399   : > { %v855_v37 = vpop.xlane.xlu1 %854 }
 0x39a   : > { %2099 = vrcp.f32 %v855_v37  ;;  %v2086_v37 = vld [vmem:[%s3016_s12 + $0x8] sm:$0xff]  }
 0x39d   : > { %v975_v39 = vpop.permute.xlu1 %974 }
 0x39e   : > { %v980_v42 = vsel %vm862_vm4, %v975_v39, 0 }
 0x3a4   : > { %v2100_v38 = vpop.eup %2099  ;;  %1092 = vrot.lane.b32.xlu0 %v791_v53, %s2340_s0 }
 0x3a5   : > { %v857_v40 = vmul.f32 %v2100_v38, %v2092_v20  ;;  %v2088_v38 = vld [vmem:[%s2720_s21 + $0x8] sm:$0xff]  }
 0x3a7   : > { %v858_v41 = vpack.c.bf16 %v857_v40, %v857_v40 }
 0x3a9   : > { %1888 = vmatmul.mubr.msk.bf16.vlgmr.msra.gmra.mrb[8].mxu0 %vm792_vm3, %v858_v41 }
 0x3aa   : > { %1898 = vmatpush3.bf16.msra.mxu0 %v980_v42  ;;  %1899 = vmatprep.mubr.msk.bf16.mxu0 %vm2339_vm1, %v2338_v2  ;;  %v1346_v42 = vsub.s32 4, %v2754_v9 }
 0x3ab   : > { %1909 = vmatprep.subr.bf16.mxu0 %v2338_v2 }
 0x40b   : > { %v969_v43 = vpop.xlane.xlu0 %968 }
 0x40c   : > { %2101 = vrcp.f32 %v969_v43  ;;  %v1351_v43 = vsub.s32 5, %v2754_v9 }
 0x413   : > { %v1088_v44 = vpop.xlane.xlu1 %1087 }
 0x414   : > { %2103 = vrcp.f32 %v1088_v44  ;;  %v1347_v44 = vrot.slane %v2758_v11, %v1346_v42 }
 0x416   : > { %v2102_v45 = vpop.eup %2101 }
 0x417   : > { %v971_v46 = vmul.f32 %v2102_v45, %v2094_v28  ;;  %v1211_v53 = vpop.permute.xlu1 %1210 }
 0x418   : > { %v1216_v55 = vsel %vm862_vm4, %v1211_v53, 0  ;;  %v1797_v53 = vld [vmem:[%s591_s13] ss:$0 sm:$0xff] }
 0x419   : > { %v972_v47 = vpack.c.bf16 %v971_v46, %v971_v46 }
 0x41b   : > { %1900 = vmatmul.mubr.msk.bf16.vlgmr.msra.gmra.mrb[12].mxu0 %vm792_vm3, %v972_v47  ;;  %v1206_v48 = vpop.xlane.xlu0 %1205  ;;  %v1352_v47 = vrot.slane %v2758_v11, %v1351_v43 }
 0x41c   : > { %2105 = vrcp.f32 %v1206_v48  ;;  %1911 = vmatprep.mubr.msk.bf16.mxu0 %vm2339_vm1, %v2338_v2 }
 0x41e   : > { %v2104_v49 = vpop.eup %2103 }
 0x41f   : > { %v1090_v50 = vmul.f32 %v2104_v49, %v2096_v33  ;;  %v1093_v51 = vpop.permute.xlu0 %1092 }
 0x420   : > { %v1098_v52 = vsel %vm862_vm4, %v1093_v51, 0  ;;  %v2089_v51 = vld [vmem:[%s2720_s21 + $0x10] sm:$0xff]  }
 0x421   : > { %1910 = vmatpush3.bf16.msra.mxu0 %v1098_v52  ;;  %v1091_v54 = vpack.c.bf16 %v1090_v50, %v1090_v50  ;;  %v2090_v52 = vld [vmem:[%s2720_s21 + $0x18] sm:$0xff]  }
 0x422   : > { %1921 = vmatprep.subr.bf16.mxu0 %v2338_v2 }
 0x424   : > { %1912 = vmatmul.mubr.msk.bf16.vlgmr.msra.gmra.mrb[16].mxu0 %vm792_vm3, %v1091_v54 }
 0x425   : > { %1922 = vmatpush3.bf16.msra.mxu0 %v1216_v55  ;;  %1923 = vmatprep.mubr.msk.bf16.mxu0 %vm2339_vm1, %v2338_v2 }
 0x426   : > { %v2106_v56 = vpop.eup %2105  ;;  %1935 = vmatprep.subr.bf16.mxu0 %v2338_v2 }
 0x427   : > { %v1208_v57 = vmul.f32 %v2106_v56, %v2098_v35 }
 0x429   : > { %v1209_v58 = vpack.c.bf16 %v1208_v57, %v1208_v57 }
 0x42c   : > { %1924 = vmatmul.mubr.msk.bf16.vlgmr.msra.gmra.mrb[20].mxu0 %vm792_vm3, %v1209_v58 }
 0x42d   : > { %1939 = vmatprep.mubr.msk.bf16.mxu0 %vm2339_vm1, %v2338_v2  ;;  %1936 = vmatpush3.bf16.msra.mxu0 %v2085_v36 }
 0x42e   : > { %1937 = vmatprep.subr.bf16.mxu0 %v2338_v2 }
 0x431   : > { %1938 = vmatpush3.bf16.msra.mxu0 %v2086_v37 }
 0x47c   : > { %v900_v59 = vpop.f32.mrb[8].mxu0 }
 0x47d   : > { %906 = vst.msk [vmem:[#allocation3] sm:$0xff] %vm792_vm3, %v900_v59  ;;  %v1889_v60 = vpop.f32.mrb[9].mxu0 }
 0x47e   : > { %v903_v61 = vpop.f32.mrb[10].mxu0 }
 0x47f   : > { %v1890_v62 = vpop.f32.mrb[11].mxu0  ;;  %v1433_v61 = vsub.s32 6, %v2754_v9 }
 0x4ee   : > { %v1016_v63 = vpop.f32.mrb[12].mxu0 }
 0x4ef   : > { %1023 = vrot.lane.b32.xlu1 %v1016_v63, %s2343_s30  ;;  %v1901_v0 = vpop.f32.mrb[13].mxu0 }
 0x4f0   : > { %v1019_v1 = vpop.f32.mrb[14].mxu0 }
 0x4f1   : > { %v1902_v3 = vpop.f32.mrb[15].mxu0 }
 0x4f7   : > { %v1134_v7 = vpop.f32.mrb[16].mxu0 }
 0x4f8   : > { %1141 = vrot.lane.b32.xlu0 %v1134_v7, %s2344_s26  ;;  %v1913_v8 = vpop.f32.mrb[17].mxu0 }
 0x4f9   : > { %v1137_v10 = vpop.f32.mrb[18].mxu0 }
 0x4fa   : > { %v1914_v12 = vpop.f32.mrb[19].mxu0 }
 0x4ff   : > { %v1252_v13 = vpop.f32.mrb[20].mxu0 }
 0x500   : > { %1259 = vrot.lane.b32.xlu1 %v1252_v13, %s2345_s16  ;;  %v1925_v14 = vpop.f32.mrb[21].mxu0 }
 0x501   : > { %v1255_v15 = vpop.f32.mrb[22].mxu0 }
 0x502   : > { %v1926_v16 = vpop.f32.mrb[23].mxu0 }
 0x561   : > { %v1024_v17 = vpop.permute.xlu1 %1023 }
 0x562   : > { %1027 = vst.msk [vmem:[#allocation3] sm:$0xff] %vm1026_vm5, %v1024_v17  ;;  %v1519_v17 = vsub.s32 7, %v2754_v9 }
 0x56a   : > { %v1142_v18 = vpop.permute.xlu0 %1141 }
 0x56b   : > { %1145 = vst.msk [vmem:[#allocation3] sm:$0xff] %vm1144_vm6, %v1142_v18  ;;  %v1520_v18 = vrot.slane %v2758_v11, %v1519_v17 }
 0x572   : > { %v1260_v19 = vpop.permute.xlu1 %1259 }
 0x573   : > { %1263 = vst.msk [vmem:[#allocation3] sm:$0xff] %vm1262_vm7, %v1260_v19 }
 0x57a   : > { %v1264_v20 = vld [vmem:[#allocation3] sm:$0xff] }
 0x57b   : > { %v1265_v21 = vpack.c.bf16 %v1264_v20, %v1264_v20 }
 0x57d   : > { %1932 = vmatmul.mubr.msk.bf16.vlgmr.msra.gmra.mrb[20].mxu1 %vm624_vm2, %v1265_v21  ;;  %v1806_v21 = vld [vmem:[%s2725_s5 + $0x8] ss:$0 sm:$0xff] }
 0x57e   : > { %1951 = vmatprep.mubr.msk.bf16.mxu1 %vm2339_vm1, %v2338_v2 }
 0x650   : > { %v1323_v24 = vpop.f32.mrb[20].mxu1 }
 0x651   : > { %v1324_v25 = vadd.f32 %v1323_v24, %v1273_v23  ;;  %v1933_v26 = vpop.f32.mrb[21].mxu1 }
 0x652   : > { %v1326_v27 = vpop.f32.mrb[22].mxu1 }
 0x653   : > { %v1934_v28 = vpop.f32.mrb[23].mxu1  ;;  %v1329_v29 = vadd.f32 %v1324_v25, %v2739_v5  ;;  %v2087_v5 = vld [vmem:[%s2720_s21] sm:$0xff]  }
 0x654   : > { %1944 = vmatpush3.bf16.msra.mxu1 %v2087_v5 }
 0x655   : > { %v1330_v30 = vsel %vm624_vm2, %v1329_v29, 0.0  ;;  %1945 = vmatprep.subr.bf16.mxu1 %v2338_v2 }
 0x656   : > { %1331 = vadd.xlane.f32.xlu0 %v1330_v30 }
 0x658   : > { %1946 = vmatpush3.bf16.msra.mxu1 %v2088_v38 }
 0x659   : > { %1947 = vmatprep.subr.bf16.mxu1 %v2338_v2 }
 0x65c   : > { %1948 = vmatpush3.bf16.msra.mxu1 %v2089_v51 }
 0x65d   : > { %1949 = vmatprep.subr.bf16.mxu1 %v2338_v2  ;;  %v1434_v2 = vrot.slane %v2758_v11, %v1433_v61 }
 0x660   : > { %1950 = vmatpush3.bf16.msra.mxu1 %v2090_v52 }
 0x6e3   : > { %v1332_v31 = vpop.xlane.xlu0 %1331 }
 0x6e4   : > { %v1334_v32 = vmul.f32 0.03125, %v1332_v31 }
 0x6e6   : > { %v1335_v33 = vsub.f32 %v1329_v29, %v1334_v32 }
 0x6e8   : > { %v1336_v34 = vmul.f32 %v1335_v33, %v1335_v33 }
 0x6ea   : > { %v1337_v35 = vsel %vm624_vm2, %v1336_v34, 0.0 }
 0x6eb   : > { %1338 = vadd.xlane.f32.xlu1 %v1337_v35 }
 0x778   : > { %v1339_v39 = vpop.xlane.xlu1 %1338 }
 0x779   : > { %v1340_v40 = vmul.f32 0.03125, %v1339_v39 }
 0x77b   : > { %v1341_v41 = vadd.f32 1e-05, %v1340_v40 }
 0x77d   : > { %2107 = vrsqrt.f32 %v1341_v41 }
 0x787   : > { %v2108_v45 = vpop.eup %2107 }
 0x788   : > { %v1343_v46 = vmul.f32 %v2108_v45, %v1335_v33 }
 0x78a   : > { %v1348_v48 = vmul.f32 %v1347_v44, %v1343_v46 }
 0x78c   : > { %v1353_v49 = vadd.f32 %v1352_v47, %v1348_v48 }
 0x78e   : > { %v1354_v50 = vpack.c.bf16 %v1353_v49, %v1353_v49 }
 0x790   : > { %1940 = vmatmul.mubr.msk.bf16.vlgmr.msra.gmra.mrb[24].mxu0 %vm624_vm2, %v1354_v50 }
 0x863   : > { %v1415_v54 = vpop.f32.mrb[24].mxu0 }
 0x864   : > { %v1416_v55 = vadd.f32 %v1797_v53, %v1415_v54  ;;  %v1941_v56 = vpop.f32.mrb[25].mxu0 }
 0x865   : > { %v1418_v57 = vpop.f32.mrb[26].mxu0 }
 0x866   : > { %v1421_v58 = vmax.f32 %v1416_v55, 0.0  ;;  %v1942_v59 = vpop.f32.mrb[27].mxu0 }
 0x868   : > { %v1422_v60 = vpack.c.bf16 %v1421_v58, %v1421_v58 }
 0x86a   : > { %1952 = vmatmul.mubr.msk.bf16.vlgmr.msra.gmra.mrb[24].mxu1 %vm1459_vm8, %v1422_v60 }
 0x93d   : > { %v1497_v62 = vpop.f32.mrb[24].mxu1 }
 0x93e   : > { %v1498_v63 = vadd.f32 %v1497_v62, %v1434_v2  ;;  %v1953_v0 = vpop.f32.mrb[25].mxu1 }
 0x93f   : > { %v1500_v1 = vpop.f32.mrb[26].mxu1 }
 0x940   : > { %v1954_v3 = vpop.f32.mrb[27].mxu1  ;;  %v1503_v4 = vadd.f32 %v1498_v63, %v1353_v49 }
 0x942   : > { %v1504_v6 = vsel %vm624_vm2, %v1503_v4, 0.0 }
 0x943   : > { %1505 = vadd.xlane.f32.xlu0 %v1504_v6 }
 0x9d0   : > { %v1506_v7 = vpop.xlane.xlu0 %1505 }
 0x9d1   : > { %v1507_v8 = vmul.f32 0.03125, %v1506_v7 }
 0x9d3   : > { %v1508_v10 = vsub.f32 %v1503_v4, %v1507_v8 }
 0x9d5   : > { %v1509_v12 = vmul.f32 %v1508_v10, %v1508_v10 }
 0x9d7   : > { %v1510_v13 = vsel %vm624_vm2, %v1509_v12, 0.0 }
 0x9d8   : > { %1511 = vadd.xlane.f32.xlu0 %v1510_v13 }
 0xa65   : > { %v1512_v14 = vpop.xlane.xlu0 %1511 }
 0xa66   : > { %v1513_v15 = vmul.f32 0.03125, %v1512_v14 }
 0xa68   : > { %v1514_v16 = vadd.f32 1e-05, %v1513_v15 }
 0xa6a   : > { %2109 = vrsqrt.f32 %v1514_v16 }
 0xa74   : > { %v2110_v19 = vpop.eup %2109 }
 0xa75   : > { %v1516_v20 = vmul.f32 %v2110_v19, %v1508_v10  ;;  %1531 = sbr.rel (%p1807_p12) target bundleno = 2684 (0xa7c), region = 80 }
 0xa77   : > { %v1521_v22 = vmul.f32 %v1520_v18, %v1516_v20 }
 0xa79   : > { %v1526_v23 = vadd.f32 %v1806_v21, %v1521_v22 }
 0xa7b   : > { %1527 = vst.msk [vmem:[#allocation2] sm:$0xff] %vm624_vm2, %v1526_v23  ;;  %1532 = vst.msk [vmem:[%s2731_s4] sm:$0xff] (!%p1807_p12), %vm624_vm2, %v1526_v23 }
 0xa7c PF: > { %s3018_s21 = sld [smem:[#allocation17_spill]]  ;;  %s3019_s24 = sld [smem:[#allocation25_spill]] }
 0xa7d   : > { %s3020_s18 = sld [smem:[#allocation37_spill]]  ;;  %s1547_s1 = sshll.u32 %s2731_s4, 4  ;;  %s1548_s1 = int_to_ptr.vmem [resolvable:$true] %s1547_s1 }
 0xa7e   : > { %s1534_s5 = scalar_lea.sflag [#allocation6], %s2673_s27  ;;  %s2201_s7 = scalar_lea.vmem %s1548_s1, 128 }
 0xa7f   : > { %p2202_p8 = scmp.ne.s32.totalorder %s1548_s1, %s2201_s7  ;;  %s2346_s19 = smov [#allocation10]  }
 0xa80   : > { %s2205_s8 = sshll.u32 %s2346_s19, 4  ;;  %s2206_s8 = int_to_ptr.vmem [resolvable:$false] %s2205_s8 }
 0xa81   : > { %s2207_s13 = scalar_lea.vmem %s2206_s8, 256  ;;  %p2208_p3 = scmp.lt.s32.totalorder %s1548_s1, %s2206_s8 }
 0xa82   : > { %s1809_s22 = sshll.u32 %s3018_s21, 7  ;;  %p3022_p6 = scmp.ne.s32.totalorder %s3019_s24, 0 }
 0xa83   : > { %s3021_s25 = smov %s3020_s18  ;;  %s2881_s11 = scalar_lea.hbm %s3020_s18, %s1809_s22 }
 0xa84   : > { %p2203_p11 = pnand %p2202_p8, %p3022_p6  ;;  %p2209_p2 = scmp.lt.s32.totalorder %s2207_s13, %s2201_s7 }
 0xa86   : > { %p2204_p0 = pneg %p2203_p11  ;;  %p2210_p5 = por %p2209_p2, %p2208_p3 }
 0xa88   : > { %p2211_p4 = pnand %p2210_p5, %p2204_p0 }
 0xa8a   : > { %2214 = shalt.err (!%p2211_p4)
}
 0xa8b   : > { %s2215_s4 = scalar_lea.hbm %s2881_s11, 128  ;;  %s2219_s2 = scalar_lea.hbm %s3021_s25, 256 }
 0xa8c   : > { %p2216_p9 = scmp.ne.s32.totalorder %s2881_s11, %s2215_s4  ;;  %p2220_p7 = scmp.lt.u32.totalorder %s2881_s11, %s3021_s25 }
 0xa8d   : > { %p2221_p10 = scmp.lt.u32.totalorder %s2219_s2, %s2215_s4  ;;  %p2223_p8 = scmp.lt.u32.totalorder %s2215_s4, %s2881_s11 }
 0xa8e   : > { %p2217_p1 = pnand %p2216_p9, %p3022_p6 }
 0xa8f   : > { %p2222_p12 = por %p2221_p10, %p2220_p7 }
 0xa90   : > { %p2218_p13 = pneg %p2217_p1 }
 0xa91   : > { %p2224_p11 = por %p2223_p8, %p2222_p12 }
 0xa93   : > { %p2225_p0 = pnand %p2224_p11, %p2218_p13 }
 0xa95   : > { %2228 = shalt.err (!%p2225_p0)
}
 0xa96   : > { %1961 = dma.vmem_to_hbm [thread:$0]  (%p3022_p6), %s1548_s1, 128, %s2881_s11, %s1534_s5  }
 0xa97 PF: > { %s3023_s30 = sld [smem:[#allocation20_spill]]  ;;  %s3024_s26 = sld [smem:[#allocation15_spill]] }
 0xa98   : > { %s3025_s16 = sld [smem:[#allocation26_spill]] }
 0xa9d   : > { %p1978_p3 = scmp.ge.s32.totalorder %s3023_s30, 2  ;;  %s1559_s20 = sand.u32 1, %s3024_s26  }
 0xa9e   : > { %p3026_p2 = scmp.ne.s32.totalorder %s3025_s16, 0  ;;  %s1560_s12 = scalar_lea.sflag [#allocation6], %s1559_s20 }
 0xaa0   : > { %p1974_p5 = pnand %p1978_p3, %p3026_p2 }
 0xaa2   : > { %2286 = dma.done.wait (!%p1974_p5), %s1560_s12, 128  }
 0xaa3   : > { %2288 = vsyncadd (!%p1974_p5), %s1560_s12, 4294967168  ;;  %s29_s23 = sadd.s32 1, %s3023_s30   ;;  %s3027_s10 = sld [smem:[#allocation23_spill]] }
 0xaa4   : > { %p26_p4 = scmp.ge.s32.totalorder %s29_s23, 6   ;;  %s3028_s28 = sld [smem:[#allocation16_spill]] }
 0xaa5   : > { %s3029_s18 = sld [smem:[#allocation24_spill]]  ;;  %s3030_s19 = sld [smem:[#allocation18_spill]] }
 0xaa6   : > { %s3031_s20 = sld [smem:[#allocation19_spill]]  ;;  %s3032_s21 = sld [smem:[#allocation21_spill]] }
 0xaa7   : > { %s3033_s22 = sld [smem:[#allocation22_spill]]  ;;  %s3034_s13 = smov %s2295_s14 }
 0xaa8   : > { %s3035_s14 = smov %s2299_s15  ;;  %s3037_s16 = smov %s2307_s17 }
 0xaa9   : > { %s3036_s15 = smov %s3027_s10  ;;  %28 = sbr.rel (!%p26_p4) target bundleno = 23 (0x17), region = 158 }
 0xaaa   : > { %s3038_s17 = smov %s3028_s28 }
 0xab0   :  { %1565 = vsyncpa [#allocation5], 1 }
 0xab1   :  { %1567 = vsyncpa [#allocation5 + $0x1], 1 }
 0xab2   :  { %1568 = vsyncpa [#allocation8], 1 }
 0xab3   :  { %1570 = vsyncpa [#allocation8 + $0x1], 1 }
 0xab4   :  { %1571 = vsyncpa [#allocation6], 1 }
 0xab5   :  { %1573 = vsyncpa [#allocation6 + $0x1], 1 }

</bundles_post_ra>
